<compile_context>
chip_gen: v7x
topology: tpu7x:2x2x1
jax: 0.10.0
libtpu: 0.0.40
codegen_flags: <defaults>
</compile_context>

<pallas_src>
import jax
import jax.numpy as jnp
from jax.experimental import pallas as pl
from jax.experimental.pallas import tpu as pltpu

# m_ctabl default dims
D1, T1 = 40, 10      # input    (features, time)
D2, T2 = 60, 10      # BL
D3, T3 = 120, 5      # BL2
D4, T4 = 3, 1        # TABL head / classes

F0 = D1 * T1         # 400 flattened input
F1 = D2 * T2         # 600 flattened BL output
F2 = D3 * T3         # 600 flattened BL2 output
F3 = D4 * T3         # 15  flattened TABL pre-output
F4 = D4 * T4         # 3   flattened logits

BLOCK_B_MAX = 1024                     # samples per grid step (cap)
VMEM_LIMIT_BYTES = 48 * 1024 * 1024    # > v5e's 16 MiB default; < v7x's 64 MiB physical


def ctabl_kernel(x_ref, m_bl_ref, b1_ref, m_bl2_ref, b2_ref,
                 m_z_ref, m_e_ref, gsum_ref, m_out_ref, b3_ref, lam_ref,
                 out_ref):
    f32, bf16 = jnp.float32, jnp.bfloat16

    x = x_ref[...].astype(bf16)                                    # (BB, F0)

    # ---- BL:  relu(W1 @ x @ W2 + B)  ==  relu(x_flat @ kron(W1^T, W2) + b_flat)
    h = jnp.dot(x, m_bl_ref[...], preferred_element_type=f32)      # (BB, F1), f32 acc
    h = jnp.maximum(h + b1_ref[...], 0.0).astype(bf16)             # cast once, right here
    # TODO(synk): training-mode dropout (p=0.1) not implemented; eval forward = identity.

    # ---- BL2
    g = jnp.dot(h, m_bl2_ref[...], preferred_element_type=f32)     # (BB, F2)
    g = jnp.maximum(g + b2_ref[...], 0.0).astype(bf16)

    # ---- TABL:  z = W1 @ g        (flat:  g @ kron(W1^T, I_T3))
    z = jnp.dot(g, m_z_ref[...], preferred_element_type=f32)       # (BB, F3), f32

    #      E = z @ W_eff            (flat:  z @ kron(I_D4, W_eff))
    e = jnp.dot(z.astype(bf16), m_e_ref[...],
                preferred_element_type=f32)                        # (BB, F3)

    # attention softmax over T3 within each of the D4 groups, lane-aligned.
    # Per-GROUP max (not per-row): a group whose logits sit far below another
    # group's can never underflow its own exp()/denominator to zero.
    lane = jax.lax.broadcasted_iota(jnp.int32, e.shape, 1)         # 0..F3-1 along lanes
    gmax = jnp.zeros_like(e)
    for d in range(D4):                                            # D4 = 3, static unroll
        in_g = (lane >= d * T3) & (lane < (d + 1) * T3)
        m_d = jnp.max(jnp.where(in_g, e, -jnp.inf), axis=-1, keepdims=True)
        gmax = jnp.where(in_g, m_d, gmax)
    es = jnp.exp(e - gmax)                                         # (BB, F3), f32
    denom = jnp.dot(es.astype(bf16), gsum_ref[...],
                    preferred_element_type=f32)                    # per-group sums
    a = es / denom

    lam = lam_ref[0]                                               # scalar from SMEM
    zm = z * (lam + (1.0 - lam) * a)                               # fused lambda blend

    # y = X @ W2 + B                (flat:  zm @ kron(I_D4, W2) + b_flat)
    y = jnp.dot(zm.astype(bf16), m_out_ref[...],
                preferred_element_type=f32) + b3_ref[...]          # (BB, F4)

    # final class softmax (== torch.squeeze + softmax(dim=1)), stored transposed
    # so the store is lane-dense along the batch axis.
    yt = y.T                                                       # (F4, BB)
    yt = yt - jnp.max(yt, axis=0, keepdims=True)
    p = jnp.exp(yt)
    out_ref[...] = p / jnp.sum(p, axis=0, keepdims=True)


def _max_norm(w):
    # torch.linalg.matrix_norm default = Frobenius; renormalize if norm > 10
    norm = jnp.sqrt(jnp.sum(w * w))
    desired = jnp.clip(norm, 0.0, 10.0)
    return jnp.where(norm > 10.0, w * desired / (1e-8 + norm), w)


def _prepare_constants(params):
    """Hoist all weight prep (max-norm, lambda clamp, kron operators, flattened
    biases, bf16 casts) out of the kernel; computed once per forward."""
    f32, bf16 = jnp.float32, jnp.bfloat16
    bl_w1 = _max_norm(params['bl_w1'])
    bl_w2 = _max_norm(params['bl_w2'])
    bl2_w1 = _max_norm(params['bl2_w1'])
    bl2_w2 = _max_norm(params['bl2_w2'])
    ta_w1 = _max_norm(params['ta_w1'])
    ta_w = _max_norm(params['ta_w'])
    ta_w2 = _max_norm(params['ta_w2'])
    lam = jnp.clip(params['ta_l'].astype(f32), 0.0, 1.0)           # (1,)

    eye_t3 = jnp.eye(T3, dtype=f32)
    eye_d4 = jnp.eye(D4, dtype=f32)
    w_eff = ta_w - ta_w * eye_t3 + eye_t3 / T3                     # zero diag -> 1/T3

    # fused flat-sample operators:  rowvec(x) @ kron(A^T, B) == rowvec(A @ x @ B)
    return dict(
        m_bl=jnp.kron(bl_w1.T, bl_w2).astype(bf16),                       # (F0, F1)
        m_bl2=jnp.kron(bl2_w1.T, bl2_w2).astype(bf16),                    # (F1, F2)
        m_z=jnp.kron(ta_w1.T, eye_t3).astype(bf16),                       # (F2, F3)
        m_e=jnp.kron(eye_d4, w_eff).astype(bf16),                         # (F3, F3)
        gsum=jnp.kron(eye_d4, jnp.ones((T3, T3), f32)).astype(bf16),      # group mask
        m_out=jnp.kron(eye_d4, ta_w2).astype(bf16),                       # (F3, F4)
        b1=params['bl_b'].reshape(1, F1).astype(f32),
        b2=params['bl2_b'].reshape(1, F2).astype(f32),
        b3=params['ta_b'].reshape(1, F4).astype(f32),
        lam=lam,
    )


def _choose_block(batch):
    """(block_batch, num_blocks): >=2 blocks for larger batches so both v7x
    TensorCores get work, block capped at BLOCK_B_MAX, blocked batch dim kept a
    multiple of 128 for lane-dense output stores."""
    if batch <= 128:
        return batch, 1
    half = -(-batch // 2)                               # ceil(batch / 2)
    bb = min(BLOCK_B_MAX, ((half + 127) // 128) * 128)
    nb = -(-batch // bb)
    return bb, nb


def _const_spec(shape):
    # full-array block, same tile every grid step -> the pipeline fetches it once.
    return pl.BlockSpec(shape, lambda b, _n=len(shape): (0,) * _n)


@jax.jit
def ctabl_forward(x, params):
    """x: (B, D1, T1) -> (B, D4) class probabilities (eval-mode forward)."""
    B = x.shape[0]
    c = _prepare_constants(params)

    # x keeps its input dtype; the bf16 cast happens inside the kernel, so an
    # upstream bf16 producer halves the only per-step HBM read with no extra pass.
    x_flat = x.reshape(B, F0)

    bb, nb = _choose_block(B)

    grid_spec = pltpu.PrefetchScalarGridSpec(
        num_scalar_prefetch=0,
        grid=(nb,),
        in_specs=[
            pl.BlockSpec((bb, F0), lambda b: (b, 0)),              # one batch block / step
            _const_spec((F0, F1)), _const_spec((1, F1)),
            _const_spec((F1, F2)), _const_spec((1, F2)),
            _const_spec((F2, F3)), _const_spec((F3, F3)),
            _const_spec((F3, F3)), _const_spec((F3, F4)),
            _const_spec((1, F4)),
            pl.BlockSpec(memory_space=pltpu.MemorySpace.SMEM),     # lambda scalar
        ],
        out_specs=pl.BlockSpec((D4, bb), lambda b: (0, b)),        # lane-dense store
    )

    out_t = pl.pallas_call(
        ctabl_kernel,
        out_shape=jax.ShapeDtypeStruct((D4, B), jnp.float32),      # exactly B: no padding,
        grid_spec=grid_spec,                                       # last block masked by Pallas
        compiler_params=pltpu.CompilerParams(
            dimension_semantics=("parallel",),
            vmem_limit_bytes=VMEM_LIMIT_BYTES),
    )(x_flat, c['m_bl'], c['b1'], c['m_bl2'], c['b2'],
      c['m_z'], c['m_e'], c['gsum'], c['m_out'], c['b3'], c['lam'])

    return out_t.T                                                 # (B, D4)


def ctabl_reference(x, params):
    """Pure-JAX f32 reference mirroring the PyTorch forward (eval mode)."""
    f32 = jnp.float32
    bl_w1 = _max_norm(params['bl_w1']); bl_w2 = _max_norm(params['bl_w2'])
    bl2_w1 = _max_norm(params['bl2_w1']); bl2_w2 = _max_norm(params['bl2_w2'])
    ta_w1 = _max_norm(params['ta_w1']); ta_w = _max_norm(params['ta_w'])
    ta_w2 = _max_norm(params['ta_w2'])
    lam = jnp.clip(params['ta_l'], 0.0, 1.0)[0]

    h = jnp.einsum('ij,bjk,kl->bil', bl_w1, x, bl_w2) + params['bl_b']
    h = jnp.maximum(h, 0.0)
    g = jnp.einsum('ij,bjk,kl->bil', bl2_w1, h, bl2_w2) + params['bl2_b']
    g = jnp.maximum(g, 0.0)
    z = jnp.einsum('ij,bjk->bik', ta_w1, g)
    eye = jnp.eye(T3, dtype=f32)
    w_eff = ta_w - ta_w * eye + eye / T3
    e = jnp.einsum('bij,jk->bik', z, w_eff)
    a = jax.nn.softmax(e, axis=-1)
    zm = lam * z + (1.0 - lam) * z * a
    y = jnp.einsum('bij,jk->bik', zm, ta_w2) + params['ta_b']
    return jax.nn.softmax(y[:, :, 0], axis=-1)


def ctabl_matched_reference(x, params):
    """Plain-jnp reference mirroring the kernel's exact numerics (same kron
    operators, same bf16 cast points) — tight check of the Pallas plumbing."""
    f32, bf16 = jnp.float32, jnp.bfloat16
    c = _prepare_constants(params)
    B = x.shape[0]
    xf = x.reshape(B, F0).astype(bf16)
    h = jnp.maximum(jnp.dot(xf, c['m_bl'], preferred_element_type=f32) + c['b1'], 0.0).astype(bf16)
    g = jnp.maximum(jnp.dot(h, c['m_bl2'], preferred_element_type=f32) + c['b2'], 0.0).astype(bf16)
    z = jnp.dot(g, c['m_z'], preferred_element_type=f32)
    e = jnp.dot(z.astype(bf16), c['m_e'], preferred_element_type=f32)
    e3 = e.reshape(B, D4, T3)
    es = jnp.exp(e3 - jnp.max(e3, axis=-1, keepdims=True)).reshape(B, F3)
    denom = jnp.dot(es.astype(bf16), c['gsum'], preferred_element_type=f32)
    a = es / denom
    lam = c['lam'][0]
    zm = z * (lam + (1.0 - lam) * a)
    y = jnp.dot(zm.astype(bf16), c['m_out'], preferred_element_type=f32) + c['b3']
    return jax.nn.softmax(y, axis=-1)


def kaiming_uniform(key, shape):
    # kaiming_uniform_(nonlinearity='relu'): bound = sqrt(2) * sqrt(3 / fan_in)
    fan_in = shape[1]
    bound = (6.0 / fan_in) ** 0.5
    return jax.random.uniform(key, shape, jnp.float32, -bound, bound)


if __name__ == "__main__":
    key = jax.random.PRNGKey(0)
    k = jax.random.split(key, 8)

    params = {
        'bl_w1': kaiming_uniform(k[0], (D2, D1)),
        'bl_w2': kaiming_uniform(k[1], (T1, T2)),
        'bl_b': jnp.zeros((D2, T2), jnp.float32),
        'bl2_w1': kaiming_uniform(k[2], (D3, D2)),
        'bl2_w2': kaiming_uniform(k[3], (T2, T3)),
        'bl2_b': jnp.zeros((D3, T3), jnp.float32),
        'ta_w1': kaiming_uniform(k[4], (D4, D3)),
        'ta_w': jnp.full((T3, T3), 1.0 / T3, jnp.float32),
        'ta_w2': kaiming_uniform(k[5], (T3, T4)),
        'ta_b': jnp.zeros((D4, T4), jnp.float32),
        'ta_l': jnp.array([0.5], jnp.float32),
    }

    def check(batch_key, B):
        x = jax.random.normal(batch_key, (B, D1, T1), jnp.float32)
        out = jax.block_until_ready(ctabl_forward(x, params))
        assert out.shape == (B, D4)
        assert bool(jnp.all(jnp.isfinite(out)))
        assert bool(jnp.allclose(jnp.sum(out, axis=1), 1.0, atol=1e-5))   # valid softmax rows
        # tight check vs the numerics-matched jnp reference (same bf16 cast points)
        matched = ctabl_matched_reference(x, params)
        assert bool(jnp.allclose(out, matched, atol=1e-2)), "kernel vs matched-ref mismatch"
        # loose sanity check vs full-f32 PyTorch-equivalent math (bf16 weights/activations)
        ref = ctabl_reference(x, params)
        assert bool(jnp.allclose(out, ref, atol=1e-1)), "kernel vs f32-ref mismatch"

    # small batch: single grid step, full-array (unpadded) blocks
    check(k[6], 2)
    # larger batch: blocked grid (bb=256, nb=2) with a partial last block, no wrapper pad
    check(k[7], 300)

    print("KERNEL_OK")
</pallas_src>

<mosaic_0001>
module attributes {stable_mosaic.version = 11 : i64} {
  func.func @ctabl_kernel(%arg0: i32, %arg1: memref<2x400xf32, #tpu.memory_space<vmem>>, %arg2: memref<400x600xbf16, #tpu.memory_space<vmem>>, %arg3: memref<1x600xf32, #tpu.memory_space<vmem>>, %arg4: memref<600x600xbf16, #tpu.memory_space<vmem>>, %arg5: memref<1x600xf32, #tpu.memory_space<vmem>>, %arg6: memref<600x15xbf16, #tpu.memory_space<vmem>>, %arg7: memref<15x15xbf16, #tpu.memory_space<vmem>>, %arg8: memref<15x15xbf16, #tpu.memory_space<vmem>>, %arg9: memref<15x3xbf16, #tpu.memory_space<vmem>>, %arg10: memref<1x3xf32, #tpu.memory_space<vmem>>, %arg11: memref<1xf32, #tpu.memory_space<smem>>, %arg12: memref<3x2xf32, #tpu.memory_space<vmem>>) attributes {dimension_semantics = [#tpu.dimension_semantics<parallel>], iteration_bounds = array<i64: 1>, scalar_prefetch = 0 : i64, scratch_operands = 0 : i64, tpu.core_type = #tpu.core_type<tc>, window_params = [{transform_indices = @transform_0, window_bounds = array<i64: 2, 400>}, {pipeline_mode = #tpu.pipeline_mode<synchronous>, transform_indices = @transform_1, window_bounds = array<i64: 400, 600>}, {pipeline_mode = #tpu.pipeline_mode<synchronous>, transform_indices = @transform_2, window_bounds = array<i64: 1, 600>}, {pipeline_mode = #tpu.pipeline_mode<synchronous>, transform_indices = @transform_3, window_bounds = array<i64: 600, 600>}, {pipeline_mode = #tpu.pipeline_mode<synchronous>, transform_indices = @transform_4, window_bounds = array<i64: 1, 600>}, {pipeline_mode = #tpu.pipeline_mode<synchronous>, transform_indices = @transform_5, window_bounds = array<i64: 600, 15>}, {pipeline_mode = #tpu.pipeline_mode<synchronous>, transform_indices = @transform_6, window_bounds = array<i64: 15, 15>}, {pipeline_mode = #tpu.pipeline_mode<synchronous>, transform_indices = @transform_7, window_bounds = array<i64: 15, 15>}, {pipeline_mode = #tpu.pipeline_mode<synchronous>, transform_indices = @transform_8, window_bounds = array<i64: 15, 3>}, {pipeline_mode = #tpu.pipeline_mode<synchronous>, transform_indices = @transform_9, window_bounds = array<i64: 1, 3>}, {transform_indices = @transform_10, window_bounds = array<i64: 1>}, {transform_indices = @transform_11, window_bounds = array<i64: 3, 2>}]} {
    %c0 = arith.constant 0 : index
    %c0_0 = arith.constant 0 : index
    %0 = vector.load %arg1[%c0, %c0_0] : memref<2x400xf32, #tpu.memory_space<vmem>>, vector<2x400xf32>
    %1 = arith.truncf %0 : vector<2x400xf32> to vector<2x400xbf16>
    %c0_1 = arith.constant 0 : index
    %c0_2 = arith.constant 0 : index
    %2 = vector.load %arg2[%c0_1, %c0_2] : memref<400x600xbf16, #tpu.memory_space<vmem>>, vector<400x600xbf16>
    %cst = arith.constant dense<0.000000e+00> : vector<2x600xf32>
    %3 = tpu.matmul %1, %2, %cst {dimension_numbers = #tpu.dot_dimension_numbers<[1], [0], [0], [1], [0, 0, 1, 1], [], []>} : vector<2x400xbf16>, vector<400x600xbf16>, vector<2x600xf32> -> vector<2x600xf32>
    %c0_3 = arith.constant 0 : index
    %c0_4 = arith.constant 0 : index
    %4 = vector.load %arg3[%c0_3, %c0_4] : memref<1x600xf32, #tpu.memory_space<vmem>>, vector<1x600xf32>
    %5 = vector.broadcast %4 : vector<1x600xf32> to vector<2x600xf32>
    %6 = arith.addf %3, %5 : vector<2x600xf32>
    %cst_5 = arith.constant 0.000000e+00 : f32
    %7 = vector.broadcast %cst_5 : f32 to vector<2x600xf32>
    %8 = arith.maximumf %6, %7 : vector<2x600xf32>
    %9 = arith.truncf %8 : vector<2x600xf32> to vector<2x600xbf16>
    %c0_6 = arith.constant 0 : index
    %c0_7 = arith.constant 0 : index
    %10 = vector.load %arg4[%c0_6, %c0_7] : memref<600x600xbf16, #tpu.memory_space<vmem>>, vector<600x600xbf16>
    %cst_8 = arith.constant dense<0.000000e+00> : vector<2x600xf32>
    %11 = tpu.matmul %9, %10, %cst_8 {dimension_numbers = #tpu.dot_dimension_numbers<[1], [0], [0], [1], [0, 0, 1, 1], [], []>} : vector<2x600xbf16>, vector<600x600xbf16>, vector<2x600xf32> -> vector<2x600xf32>
    %c0_9 = arith.constant 0 : index
    %c0_10 = arith.constant 0 : index
    %12 = vector.load %arg5[%c0_9, %c0_10] : memref<1x600xf32, #tpu.memory_space<vmem>>, vector<1x600xf32>
    %13 = vector.broadcast %12 : vector<1x600xf32> to vector<2x600xf32>
    %14 = arith.addf %11, %13 : vector<2x600xf32>
    %cst_11 = arith.constant 0.000000e+00 : f32
    %15 = vector.broadcast %cst_11 : f32 to vector<2x600xf32>
    %16 = arith.maximumf %14, %15 : vector<2x600xf32>
    %17 = arith.truncf %16 : vector<2x600xf32> to vector<2x600xbf16>
    %c0_12 = arith.constant 0 : index
    %c0_13 = arith.constant 0 : index
    %18 = vector.load %arg6[%c0_12, %c0_13] : memref<600x15xbf16, #tpu.memory_space<vmem>>, vector<600x15xbf16>
    %cst_14 = arith.constant dense<0.000000e+00> : vector<2x15xf32>
    %19 = tpu.matmul %17, %18, %cst_14 {dimension_numbers = #tpu.dot_dimension_numbers<[1], [0], [0], [1], [0, 0, 1, 1], [], []>} : vector<2x600xbf16>, vector<600x15xbf16>, vector<2x15xf32> -> vector<2x15xf32>
    %20 = arith.truncf %19 : vector<2x15xf32> to vector<2x15xbf16>
    %c0_15 = arith.constant 0 : index
    %c0_16 = arith.constant 0 : index
    %21 = vector.load %arg7[%c0_15, %c0_16] : memref<15x15xbf16, #tpu.memory_space<vmem>>, vector<15x15xbf16>
    %cst_17 = arith.constant dense<0.000000e+00> : vector<2x15xf32>
    %22 = tpu.matmul %20, %21, %cst_17 {dimension_numbers = #tpu.dot_dimension_numbers<[1], [0], [0], [1], [0, 0, 1, 1], [], []>} : vector<2x15xbf16>, vector<15x15xbf16>, vector<2x15xf32> -> vector<2x15xf32>
    %23 = tpu.iota {dimensions = array<i32: 1>} : vector<2x15xi32>
    %cst_18 = arith.constant 0.000000e+00 : f32
    %24 = vector.broadcast %cst_18 : f32 to vector<2x15xf32>
    %c0_i32 = arith.constant 0 : i32
    %25 = vector.broadcast %c0_i32 : i32 to vector<2x15xi32>
    %26 = arith.cmpi sge, %23, %25 : vector<2x15xi32>
    %c5_i32 = arith.constant 5 : i32
    %27 = vector.broadcast %c5_i32 : i32 to vector<2x15xi32>
    %28 = arith.cmpi slt, %23, %27 : vector<2x15xi32>
    %29 = arith.andi %26, %28 : vector<2x15xi1>
    %cst_19 = arith.constant 0xFF800000 : f32
    %30 = vector.broadcast %cst_19 : f32 to vector<2x15xf32>
    %31 = arith.select %29, %22, %30 : vector<2x15xi1>, vector<2x15xf32>
    %cst_20 = arith.constant dense<0xFF800000> : vector<2xf32>
    %32 = vector.multi_reduction <maximumf>, %31, %cst_20 [1] : vector<2x15xf32> to vector<2xf32>
    %33 = vector.shape_cast %32 : vector<2xf32> to vector<2x1xf32>
    %34 = vector.shape_cast %33 : vector<2x1xf32> to vector<2x1xf32>
    %35 = vector.broadcast %34 : vector<2x1xf32> to vector<2x15xf32>
    %36 = arith.select %29, %35, %24 : vector<2x15xi1>, vector<2x15xf32>
    %c5_i32_21 = arith.constant 5 : i32
    %37 = vector.broadcast %c5_i32_21 : i32 to vector<2x15xi32>
    %38 = arith.cmpi sge, %23, %37 : vector<2x15xi32>
    %c10_i32 = arith.constant 10 : i32
    %39 = vector.broadcast %c10_i32 : i32 to vector<2x15xi32>
    %40 = arith.cmpi slt, %23, %39 : vector<2x15xi32>
    %41 = arith.andi %38, %40 : vector<2x15xi1>
    %cst_22 = arith.constant 0xFF800000 : f32
    %42 = vector.broadcast %cst_22 : f32 to vector<2x15xf32>
    %43 = arith.select %41, %22, %42 : vector<2x15xi1>, vector<2x15xf32>
    %cst_23 = arith.constant dense<0xFF800000> : vector<2xf32>
    %44 = vector.multi_reduction <maximumf>, %43, %cst_23 [1] : vector<2x15xf32> to vector<2xf32>
    %45 = vector.shape_cast %44 : vector<2xf32> to vector<2x1xf32>
    %46 = vector.shape_cast %45 : vector<2x1xf32> to vector<2x1xf32>
    %47 = vector.broadcast %46 : vector<2x1xf32> to vector<2x15xf32>
    %48 = arith.select %41, %47, %36 : vector<2x15xi1>, vector<2x15xf32>
    %c10_i32_24 = arith.constant 10 : i32
    %49 = vector.broadcast %c10_i32_24 : i32 to vector<2x15xi32>
    %50 = arith.cmpi sge, %23, %49 : vector<2x15xi32>
    %c15_i32 = arith.constant 15 : i32
    %51 = vector.broadcast %c15_i32 : i32 to vector<2x15xi32>
    %52 = arith.cmpi slt, %23, %51 : vector<2x15xi32>
    %53 = arith.andi %50, %52 : vector<2x15xi1>
    %cst_25 = arith.constant 0xFF800000 : f32
    %54 = vector.broadcast %cst_25 : f32 to vector<2x15xf32>
    %55 = arith.select %53, %22, %54 : vector<2x15xi1>, vector<2x15xf32>
    %cst_26 = arith.constant dense<0xFF800000> : vector<2xf32>
    %56 = vector.multi_reduction <maximumf>, %55, %cst_26 [1] : vector<2x15xf32> to vector<2xf32>
    %57 = vector.shape_cast %56 : vector<2xf32> to vector<2x1xf32>
    %58 = vector.shape_cast %57 : vector<2x1xf32> to vector<2x1xf32>
    %59 = vector.broadcast %58 : vector<2x1xf32> to vector<2x15xf32>
    %60 = arith.select %53, %59, %48 : vector<2x15xi1>, vector<2x15xf32>
    %61 = arith.subf %22, %60 : vector<2x15xf32>
    %62 = math.exp %61 : vector<2x15xf32>
    %63 = arith.truncf %62 : vector<2x15xf32> to vector<2x15xbf16>
    %c0_27 = arith.constant 0 : index
    %c0_28 = arith.constant 0 : index
    %64 = vector.load %arg8[%c0_27, %c0_28] : memref<15x15xbf16, #tpu.memory_space<vmem>>, vector<15x15xbf16>
    %cst_29 = arith.constant dense<0.000000e+00> : vector<2x15xf32>
    %65 = tpu.matmul %63, %64, %cst_29 {dimension_numbers = #tpu.dot_dimension_numbers<[1], [0], [0], [1], [0, 0, 1, 1], [], []>} : vector<2x15xbf16>, vector<15x15xbf16>, vector<2x15xf32> -> vector<2x15xf32>
    %66 = arith.divf %62, %65 : vector<2x15xf32>
    %c0_30 = arith.constant 0 : index
    %67 = memref.load %arg11[%c0_30] : memref<1xf32, #tpu.memory_space<smem>>
    %cst_31 = arith.constant 1.000000e+00 : f32
    %68 = arith.subf %cst_31, %67 : f32
    %69 = vector.broadcast %68 : f32 to vector<2x15xf32>
    %70 = arith.mulf %69, %66 : vector<2x15xf32>
    %71 = vector.broadcast %67 : f32 to vector<2x15xf32>
    %72 = arith.addf %71, %70 : vector<2x15xf32>
    %73 = arith.mulf %19, %72 : vector<2x15xf32>
    %74 = arith.truncf %73 : vector<2x15xf32> to vector<2x15xbf16>
    %c0_32 = arith.constant 0 : index
    %c0_33 = arith.constant 0 : index
    %75 = vector.load %arg9[%c0_32, %c0_33] : memref<15x3xbf16, #tpu.memory_space<vmem>>, vector<15x3xbf16>
    %cst_34 = arith.constant dense<0.000000e+00> : vector<2x3xf32>
    %76 = tpu.matmul %74, %75, %cst_34 {dimension_numbers = #tpu.dot_dimension_numbers<[1], [0], [0], [1], [0, 0, 1, 1], [], []>} : vector<2x15xbf16>, vector<15x3xbf16>, vector<2x3xf32> -> vector<2x3xf32>
    %c0_35 = arith.constant 0 : index
    %c0_36 = arith.constant 0 : index
    %77 = vector.load %arg10[%c0_35, %c0_36] : memref<1x3xf32, #tpu.memory_space<vmem>>, vector<1x3xf32>
    %78 = vector.broadcast %77 : vector<1x3xf32> to vector<2x3xf32>
    %79 = arith.addf %76, %78 : vector<2x3xf32>
    %80 = tpu.transpose %79, [1, 0] : vector<2x3xf32> -> vector<3x2xf32>
    %cst_37 = arith.constant dense<0xFF800000> : vector<2xf32>
    %81 = vector.multi_reduction <maximumf>, %80, %cst_37 [0] : vector<3x2xf32> to vector<2xf32>
    %82 = vector.shape_cast %81 : vector<2xf32> to vector<1x2xf32>
    %83 = vector.broadcast %82 : vector<1x2xf32> to vector<3x2xf32>
    %84 = arith.subf %80, %83 : vector<3x2xf32>
    %85 = math.exp %84 : vector<3x2xf32>
    %cst_38 = arith.constant dense<0.000000e+00> : vector<2xf32>
    %86 = vector.multi_reduction <add>, %85, %cst_38 [0] : vector<3x2xf32> to vector<2xf32>
    %87 = vector.shape_cast %86 : vector<2xf32> to vector<1x2xf32>
    %88 = vector.broadcast %87 : vector<1x2xf32> to vector<3x2xf32>
    %89 = arith.divf %85, %88 : vector<3x2xf32>
    %c0_39 = arith.constant 0 : index
    %c0_40 = arith.constant 0 : index
    %90 = vector.load %arg12[%c0_39, %c0_40] : memref<3x2xf32, #tpu.memory_space<vmem>>, vector<3x2xf32>
    tpu.vector_store %arg12[%c0_39, %c0_40], %89 {strides = array<i32>} : memref<3x2xf32, #tpu.memory_space<vmem>>, vector<3x2xf32>,
    return
  }
  func.func @transform_0(%arg0: i32) -> (i32, i32) {
    %c0_i32 = arith.constant 0 : i32
    %c0_i32_0 = arith.constant 0 : i32
    return %arg0, %c0_i32 : i32, i32
  }
  func.func @transform_1(%arg0: i32) -> (i32, i32) {
    %c0_i32 = arith.constant 0 : i32
    %c0_i32_0 = arith.constant 0 : i32
    %c0_i32_1 = arith.constant 0 : i32
    return %c0_i32, %c0_i32_0 : i32, i32
  }
  func.func @transform_2(%arg0: i32) -> (i32, i32) {
    %c0_i32 = arith.constant 0 : i32
    %c0_i32_0 = arith.constant 0 : i32
    %c0_i32_1 = arith.constant 0 : i32
    return %c0_i32, %c0_i32_0 : i32, i32
  }
  func.func @transform_3(%arg0: i32) -> (i32, i32) {
    %c0_i32 = arith.constant 0 : i32
    %c0_i32_0 = arith.constant 0 : i32
    %c0_i32_1 = arith.constant 0 : i32
    return %c0_i32, %c0_i32_0 : i32, i32
  }
  func.func @transform_4(%arg0: i32) -> (i32, i32) {
    %c0_i32 = arith.constant 0 : i32
    %c0_i32_0 = arith.constant 0 : i32
    %c0_i32_1 = arith.constant 0 : i32
    return %c0_i32, %c0_i32_0 : i32, i32
  }
  func.func @transform_5(%arg0: i32) -> (i32, i32) {
    %c0_i32 = arith.constant 0 : i32
    %c0_i32_0 = arith.constant 0 : i32
    %c0_i32_1 = arith.constant 0 : i32
    return %c0_i32, %c0_i32_0 : i32, i32
  }
  func.func @transform_6(%arg0: i32) -> (i32, i32) {
    %c0_i32 = arith.constant 0 : i32
    %c0_i32_0 = arith.constant 0 : i32
    %c0_i32_1 = arith.constant 0 : i32
    return %c0_i32, %c0_i32_0 : i32, i32
  }
  func.func @transform_7(%arg0: i32) -> (i32, i32) {
    %c0_i32 = arith.constant 0 : i32
    %c0_i32_0 = arith.constant 0 : i32
    %c0_i32_1 = arith.constant 0 : i32
    return %c0_i32, %c0_i32_0 : i32, i32
  }
  func.func @transform_8(%arg0: i32) -> (i32, i32) {
    %c0_i32 = arith.constant 0 : i32
    %c0_i32_0 = arith.constant 0 : i32
    %c0_i32_1 = arith.constant 0 : i32
    return %c0_i32, %c0_i32_0 : i32, i32
  }
  func.func @transform_9(%arg0: i32) -> (i32, i32) {
    %c0_i32 = arith.constant 0 : i32
    %c0_i32_0 = arith.constant 0 : i32
    %c0_i32_1 = arith.constant 0 : i32
    return %c0_i32, %c0_i32_0 : i32, i32
  }
  func.func @transform_10(%arg0: i32) -> i32 {
    %c0_i32 = arith.constant 0 : i32
    %c0_i32_0 = arith.constant 0 : i32
    return %c0_i32 : i32
  }
  func.func @transform_11(%arg0: i32) -> (i32, i32) {
    %c0_i32 = arith.constant 0 : i32
    %c0_i32_0 = arith.constant 0 : i32
    return %c0_i32, %arg0 : i32, i32
  }
}

</mosaic_0001>

<bundles_post_ra>
// kernel: ctabl_forward.1
= control target key start
LH: loop header
LB: loop body
LE: loop exit
PB: predicated region body
PF: predicated region fallthrough
CT: control target
= control target key end

     0   :  { %v4546_v28 = vmov 1983009808   ;;  %v46_v30 = vlaneseq  ;;  %vm894_vm0 = vcmask 130048   ;;  %vm2383_vm1 = vcmask 1043456   ;;  %s5871_s1 = inlined_call_operand.vmem [shape: bf16[400,600], index: 1, kind: input, shape index: {}]   ;;  %s5872_s0 = inlined_call_operand.vmem [shape: f32[2,400], index: 0, kind: input, shape index: {}]   ;;  %s5873_s3 = inlined_call_operand.vmem [shape: bf16[600,600], index: 3, kind: input, shape index: {}]   ;;  %s5874_s2 = inlined_call_operand.vmem [shape: f32[1,600], index: 2, kind: input, shape index: {}]   ;;  %s5875_s5 = inlined_call_operand.vmem [shape: bf16[600,15], index: 5, kind: input, shape index: {}]   ;;  %s5876_s4 = inlined_call_operand.vmem [shape: f32[1,600], index: 4, kind: input, shape index: {}]   ;;  %s5877_s6 = inlined_call_operand.vmem [shape: bf16[15,15], index: 6, kind: input, shape index: {}]   ;;  %s5878_s7 = inlined_call_operand.vmem [shape: bf16[15,15], index: 7, kind: input, shape index: {}]   ;;  %s5879_s8 = inlined_call_operand.vmem [shape: bf16[15,3], index: 8, kind: input, shape index: {}]   ;;  %s5880_s10 = inlined_call_operand.<no memory space> [shape: f32[1], index: 10, kind: input, shape index: {}]   ;;  %s5881_s9 = inlined_call_operand.vmem [shape: f32[1,3], index: 9, kind: input, shape index: {}]   ;;  %s5882_s11 = inlined_call_operand.vmem [shape: f32[3,2], index: 11, kind: output, shape index: {}]  }
   0x1   :  { %v4057_v0 = vld [vmem:[%s5871_s1 + $0x4] ss:$20 sps:$4 sm:$0xff]   ;;  %v4059_v1 = vld [vmem:[%s5871_s1] ss:$20 sps:$4 sm:$0xff]   ;;  %v4062_v3 = vld [vmem:[%s5871_s1 + $0x28] ss:$20 sps:$4 sm:$0xff]   ;;  %v44_v29 = vunpack.c.l.s4 %v4546_v28 }
   0x2   :  { %898 = vmatprep.subr.bf16.mxu0 %v4057_v0  ;;  %v4060_v2 = vld [vmem:[%s5871_s1 + $0x2c] ss:$20 sps:$4 sm:$0xff]   ;;  %v4063_v4 = vld [vmem:[%s5871_s1 + $0x54] ss:$20 sps:$4 sm:$0xff]   ;;  %v4065_v5 = vld [vmem:[%s5871_s1 + $0x50] ss:$20 sps:$4 sm:$0xff]  }
   0x3   :  { %899 = vmatpush1.bf16.msra.mxu0 %v4059_v1  ;;  %v4071_v6 = vld [vmem:[%s5871_s1 + $0xc] ss:$20 sps:$4 sm:$0xff]   ;;  %v4074_v7 = vld [vmem:[%s5871_s1 + $0x8] ss:$20 sps:$4 sm:$0xff]   ;;  %v4080_v10 = vld [vmem:[%s5871_s1 + $0x30] ss:$20 sps:$4 sm:$0xff]   ;;  %v45_v34 = vunpack.c.0.s8 %v44_v29 }
   0x4   :  { %900 = vmatprep.subr.bf16.mxu0 %v4060_v2  ;;  %v4066_v8 = vld [vmem:[%s5871_s1 + $0x7c] ss:$20 sps:$4 sm:$0xff]   ;;  %980 = vmatprep.subr.bf16.mxu1 %v4071_v6  ;;  %v4077_v9 = vld [vmem:[%s5871_s1 + $0x34] ss:$20 sps:$4 sm:$0xff]   ;;  %v4068_v11 = vld [vmem:[%s5871_s1 + $0x78] ss:$20 sps:$4 sm:$0xff]  }
   0x5   :  { %981 = vmatpush1.bf16.msra.mxu1 %v4074_v7  ;;  %v4069_v12 = vld [vmem:[%s5871_s1 + $0xa4] ss:$20 sps:$4 sm:$0xff]   ;;  %v4083_v13 = vld [vmem:[%s5871_s1 + $0x5c] ss:$20 sps:$4 sm:$0xff]   ;;  %v4073_v15 = vld [vmem:[%s5871_s1 + $0xa0] ss:$20 sps:$4 sm:$0xff]  }
   0x6   :  { %982 = vmatprep.subr.bf16.mxu1 %v4077_v9  ;;  %v4086_v14 = vld [vmem:[%s5871_s1 + $0x58] ss:$20 sps:$4 sm:$0xff]   ;;  %v4079_v18 = vld [vmem:[%s5871_s1 + $0xc8] ss:$20 sps:$4 sm:$0xff]   ;;  %v4092_v19 = vld [vmem:[%s5871_s1 + $0x80] ss:$20 sps:$4 sm:$0xff]  }
   0x7   :  { %901 = vmatpush1.bf16.msra.mxu0 %v4062_v3  ;;  %v4089_v16 = vld [vmem:[%s5871_s1 + $0x84] ss:$20 sps:$4 sm:$0xff]   ;;  %v4075_v17 = vld [vmem:[%s5871_s1 + $0xcc] ss:$20 sps:$4 sm:$0xff]   ;;  %v4081_v21 = vld [vmem:[%s5871_s1 + $0xf4] ss:$20 sps:$4 sm:$0xff]  }
   0x8   :  { %902 = vmatprep.subr.bf16.mxu0 %v4063_v4  ;;  %v4095_v20 = vld [vmem:[%s5871_s1 + $0xac] ss:$20 sps:$4 sm:$0xff]   ;;  %v4098_v22 = vld [vmem:[%s5871_s1 + $0xa8] ss:$20 sps:$4 sm:$0xff]   ;;  %v4085_v23 = vld [vmem:[%s5871_s1 + $0xf0] ss:$20 sps:$4 sm:$0xff]  }
   0x9   :  { %983 = vmatpush1.bf16.msra.mxu1 %v4080_v10  ;;  %v4101_v24 = vld [vmem:[%s5871_s1 + $0xd4] ss:$20 sps:$4 sm:$0xff]   ;;  %v4087_v25 = vld [vmem:[%s5871_s1 + $0x11c] ss:$20 sps:$4 sm:$0xff]   ;;  %v4091_v26 = vld [vmem:[%s5871_s1 + $0x118] ss:$20 sps:$4 sm:$0xff]  }
   0xa   :  { %984 = vmatprep.subr.bf16.mxu1 %v4083_v13  ;;  %v4104_v27 = vld [vmem:[%s5871_s1 + $0xd0] ss:$20 sps:$4 sm:$0xff]   ;;  %v4110_v33 = vld [vmem:[%s5871_s1 + $0xf8] ss:$20 sps:$4 sm:$0xff]   ;;  %v4705_v35 = vshrl.u32 %v46_v30, 7  ;;  %vm2379_vm2 = vcmask 719872  }
   0xb   :  { %903 = vmatpush1.bf16.msra.mxu0 %v4065_v5  ;;  %v4107_v31 = vld [vmem:[%s5871_s1 + $0xfc] ss:$20 sps:$4 sm:$0xff]   ;;  %v4093_v32 = vld [vmem:[%s5871_s1 + $0x144] ss:$20 sps:$4 sm:$0xff]   ;;  %v4097_v36 = vld [vmem:[%s5871_s1 + $0x140] ss:$20 sps:$4 sm:$0xff]  }
   0xc   :  { %904 = vmatprep.subr.bf16.mxu0 %v4066_v8  ;;  %v4113_v37 = vld [vmem:[%s5871_s1 + $0x124] ss:$20 sps:$4 sm:$0xff]   ;;  %v4099_v38 = vld [vmem:[%s5871_s1 + $0x16c] ss:$20 sps:$4 sm:$0xff]   ;;  %v4103_v39 = vld [vmem:[%s5871_s1 + $0x168] ss:$20 sps:$4 sm:$0xff]   ;;  %v48_v41 = vsub.s32 %v45_v34, %v4705_v35 }
   0xd   :  { %985 = vmatpush1.bf16.msra.mxu1 %v4086_v14  ;;  %v4116_v40 = vld [vmem:[%s5871_s1 + $0x120] ss:$20 sps:$4 sm:$0xff]   ;;  %v4109_v45 = vld [vmem:[%s5871_s1 + $0x190] ss:$20 sps:$4 sm:$0xff]   ;;  %v4122_v46 = vld [vmem:[%s5871_s1 + $0x148] ss:$20 sps:$4 sm:$0xff]  }
   0xe   :  { %986 = vmatprep.subr.bf16.mxu1 %v4089_v16  ;;  %v4119_v42 = vld [vmem:[%s5871_s1 + $0x14c] ss:$20 sps:$4 sm:$0xff]   ;;  %v4105_v43 = vld [vmem:[%s5871_s1 + $0x194] ss:$20 sps:$4 sm:$0xff]   ;;  %v4111_v49 = vld [vmem:[%s5871_s1 + $0x1bc] ss:$20 sps:$4 sm:$0xff]  }
   0xf   :  { %905 = vmatpush1.bf16.msra.mxu0 %v4068_v11  ;;  %v40_v44 = vld [vmem:[%s5872_s0] sm:$0xff]  ;;  %v4125_v48 = vld [vmem:[%s5871_s1 + $0x174] ss:$20 sps:$4 sm:$0xff]   ;;  %v4115_v51 = vld [vmem:[%s5871_s1 + $0x1b8] ss:$20 sps:$4 sm:$0xff]   ;;  %vm4549_vm3 = vmmov 0  }
  0x10   :  { %906 = vmatprep.subr.bf16.mxu0 %v4069_v12  ;;  %v49_v47 = vrot.slane %v40_v44, %v48_v41  ;;  %v4128_v52 = vld [vmem:[%s5871_s1 + $0x170] ss:$20 sps:$4 sm:$0xff]   ;;  %v4121_v56 = vld [vmem:[%s5871_s1 + $0x1e0] ss:$20 sps:$4 sm:$0xff]   ;;  %v4134_v57 = vld [vmem:[%s5871_s1 + $0x198] ss:$20 sps:$4 sm:$0xff]   ;;  %v42_v0 = vcombine.high %v40_v44, %v40_v44 }
  0x11   :  { %987 = vmatpush1.bf16.msra.mxu1 %v4092_v19  ;;  %v4131_v54 = vld [vmem:[%s5871_s1 + $0x19c] ss:$20 sps:$4 sm:$0xff]   ;;  %v4117_v55 = vld [vmem:[%s5871_s1 + $0x1e4] ss:$20 sps:$4 sm:$0xff]   ;;  %v4123_v59 = vld [vmem:[%s5871_s1 + $0x20c] ss:$20 sps:$4 sm:$0xff]  }
  0x12   :  { %988 = vmatprep.subr.bf16.mxu1 %v4095_v20  ;;  %v57_v50 = vcombine.high %v49_v47, %v49_v47  ;;  %v4137_v58 = vld [vmem:[%s5871_s1 + $0x1c4] ss:$20 sps:$4 sm:$0xff]   ;;  %v4127_v60 = vld [vmem:[%s5871_s1 + $0x208] ss:$20 sps:$4 sm:$0xff]   ;;  %v4140_v61 = vld [vmem:[%s5871_s1 + $0x1c0] ss:$20 sps:$4 sm:$0xff]   ;;  %v4796_v5 = vrot.slane %v42_v0, %v48_v41  ;;  %v4815_v12 = vpack.c.bf16 %v49_v47, %v49_v47 }
  0x13   :  { %907 = vmatpush1.bf16.msra.mxu0 %v4073_v15  ;;  %v4145_v62 = vld [vmem:[%s5871_s1 + $0x1ec] ss:$20 sps:$4 sm:$0xff]   ;;  %v4129_v63 = vld [vmem:[%s5871_s1 + $0x234] ss:$20 sps:$4 sm:$0xff]   ;;  %v4133_v1 = vld [vmem:[%s5871_s1 + $0x230] ss:$20 sps:$4 sm:$0xff]  }
  0x14   :  { %908 = vmatprep.subr.bf16.mxu0 %v4075_v17  ;;  %v4750_v53 = vpack.c.bf16 %v57_v50, %v57_v50  ;;  %v4147_v2 = vld [vmem:[%s5871_s1 + $0x1e8] ss:$20 sps:$4 sm:$0xff]   ;;  %v4139_v6 = vld [vmem:[%s5871_s1 + $0x258] ss:$20 sps:$4 sm:$0xff]   ;;  %v4153_v7 = vld [vmem:[%s5871_s1 + $0x210] ss:$20 sps:$4 sm:$0xff]   ;;  %v58_v10 = vcombine.high %v4796_v5, %v4796_v5 }
  0x15   :  { %989 = vmatpush1.bf16.msra.mxu1 %v4098_v22  ;;  %v4151_v3 = vld [vmem:[%s5871_s1 + $0x214] ss:$20 sps:$4 sm:$0xff]   ;;  %v4135_v4 = vld [vmem:[%s5871_s1 + $0x25c] ss:$20 sps:$4 sm:$0xff]   ;;  %v4144_v9 = vld [vmem:[%s5871_s1 + $0x284] ss:$20 sps:$4 sm:$0xff]  }
  0x16   :  { %990 = vmatprep.subr.bf16.mxu1 %v4101_v24  ;;  %930 = vmatprep.mubr.bf16.mxu0 %v4750_v53  ;;  %v4157_v8 = vld [vmem:[%s5871_s1 + $0x23c] ss:$20 sps:$4 sm:$0xff]   ;;  %v4142_v11 = vld [vmem:[%s5871_s1 + $0x280] ss:$20 sps:$4 sm:$0xff]   ;;  %v4159_v13 = vld [vmem:[%s5871_s1 + $0x238] ss:$20 sps:$4 sm:$0xff]   ;;  %v4826_v16 = vpack.c.bf16 %v58_v10, %v58_v10 }
  0x17   :  { %909 = vmatpush1.bf16.msra.mxu0 %v4079_v18  ;;  %1012 = vmatprep.mubr.bf16.mxu1 %v4750_v53  ;;  %v4163_v14 = vld [vmem:[%s5871_s1 + $0x264] ss:$20 sps:$4 sm:$0xff]   ;;  %v4150_v15 = vld [vmem:[%s5871_s1 + $0x2ac] ss:$20 sps:$4 sm:$0xff]   ;;  %v4148_v17 = vld [vmem:[%s5871_s1 + $0x2a8] ss:$20 sps:$4 sm:$0xff]  }
  0x18   :  { %910 = vmatprep.subr.bf16.mxu0 %v4081_v21  ;;  %v4165_v18 = vld [vmem:[%s5871_s1 + $0x260] ss:$20 sps:$4 sm:$0xff]   ;;  %v4154_v21 = vld [vmem:[%s5871_s1 + $0x2d0] ss:$20 sps:$4 sm:$0xff]   ;;  %v4169_v22 = vld [vmem:[%s5871_s1 + $0x288] ss:$20 sps:$4 sm:$0xff]  }
  0x19   :  { %991 = vmatpush1.bf16.msra.mxu1 %v4104_v27  ;;  %v4171_v19 = vld [vmem:[%s5871_s1 + $0x28c] ss:$20 sps:$4 sm:$0xff]   ;;  %v4156_v20 = vld [vmem:[%s5871_s1 + $0x2d4] ss:$20 sps:$4 sm:$0xff]   ;;  %v4162_v24 = vld [vmem:[%s5871_s1 + $0x2fc] ss:$20 sps:$4 sm:$0xff]  }
  0x1a   :  { %992 = vmatprep.subr.bf16.mxu1 %v4107_v31  ;;  %v4183_v27 = vld [vmem:[%s5871_s1 + $0x2dc] ss:$20 sps:$4 sm:$0xff]   ;;  %v4168_v28 = vld [vmem:[%s5871_s1 + $0x324] ss:$20 sps:$4 sm:$0xff]   ;;  %v4166_v29 = vld [vmem:[%s5871_s1 + $0x320] ss:$20 sps:$4 sm:$0xff]  }
  0x1b   :  { %911 = vmatpush1.bf16.msra.mxu0 %v4085_v23  ;;  %v4177_v23 = vld [vmem:[%s5871_s1 + $0x2b4] ss:$20 sps:$4 sm:$0xff]   ;;  %v4181_v31 = vld [vmem:[%s5871_s1 + $0x2d8] ss:$20 sps:$4 sm:$0xff]   ;;  %v4196_v44 = vld [vmem:[%s5871_s1 + $0x350] ss:$20 sps:$4 sm:$0xff]  }
  0x1c   :  { %912 = vmatprep.subr.bf16.mxu0 %v4087_v25  ;;  %v4160_v25 = vld [vmem:[%s5871_s1 + $0x2f8] ss:$20 sps:$4 sm:$0xff]   ;;  %v4172_v34 = vld [vmem:[%s5871_s1 + $0x348] ss:$20 sps:$4 sm:$0xff]   ;;  %v4208_v50 = vld [vmem:[%s5871_s1 + $0x150] ss:$20 sps:$4 sm:$0xff]  }
  0x1d   :  { %993 = vmatpush1.bf16.msra.mxu1 %v4110_v33  ;;  %v4174_v33 = vld [vmem:[%s5871_s1 + $0x34c] ss:$20 sps:$4 sm:$0xff]   ;;  %v4198_v41 = vld [vmem:[%s5871_s1 + $0x354] ss:$20 sps:$4 sm:$0xff]   ;;  %vm3213_vm4 = vcmask 1046528   ;;  %vm3214_vm5 = vcmask 1047552  }
  0x1e   :  { %994 = vmatprep.subr.bf16.mxu1 %v4113_v37  ;;  %v4195_v37 = vld [vmem:[%s5871_s1 + $0x32c] ss:$20 sps:$4 sm:$0xff]   ;;  %v4218_v0 = vld [vmem:[%s5871_s1 + $0x88] ss:$20 sps:$4 sm:$0xff]   ;;  %vm3209_vm6 = vcmask 121856   ;;  %vm3266_vm13 = vcmask 115712  }
  0x1f   :  { %913 = vmatpush1.bf16.msra.mxu0 %v4091_v26  ;;  %v4175_v26 = vld [vmem:[%s5871_s1 + $0x2b0] ss:$20 sps:$4 sm:$0xff]   ;;  %v4199_v47 = vld [vmem:[%s5871_s1 + $0x378] ss:$20 sps:$4 sm:$0xff]   ;;  %v4229_v10 = vld [vmem:[%s5871_s1 + $0x268] ss:$20 sps:$4 sm:$0xff]  }
  0x20   :  { %914 = vmatprep.subr.bf16.mxu0 %v4093_v32  ;;  %v4189_v32 = vld [vmem:[%s5871_s1 + $0x304] ss:$20 sps:$4 sm:$0xff]   ;;  %s3347_s14 = ssub.f32 1.0, %s5880_s10  ;;  %vm3446_vm15 = vcmask 10240  }
  0x21   :  { %995 = vmatpush1.bf16.msra.mxu1 %v4116_v40  ;;  %v4193_v40 = vld [vmem:[%s5871_s1 + $0x328] ss:$20 sps:$4 sm:$0xff]  }
  0x22   :  { %996 = vmatprep.subr.bf16.mxu1 %v4119_v42  ;;  %v4186_v42 = vld [vmem:[%s5871_s1 + $0x39c] ss:$20 sps:$4 sm:$0xff]  }
  0x23   :  { %915 = vmatpush1.bf16.msra.mxu0 %v4097_v36  ;;  %v4187_v36 = vld [vmem:[%s5871_s1 + $0x300] ss:$20 sps:$4 sm:$0xff]  }
  0x24   :  { %916 = vmatprep.subr.bf16.mxu0 %v4099_v38  ;;  %v4180_v38 = vld [vmem:[%s5871_s1 + $0x374] ss:$20 sps:$4 sm:$0xff]  }
  0x25   :  { %997 = vmatpush1.bf16.msra.mxu1 %v4122_v46  ;;  %v4192_v46 = vld [vmem:[%s5871_s1 + $0x3c4] ss:$20 sps:$4 sm:$0xff]  }
  0x26   :  { %998 = vmatprep.subr.bf16.mxu1 %v4125_v48  ;;  %v4190_v48 = vld [vmem:[%s5871_s1 + $0x3c0] ss:$20 sps:$4 sm:$0xff]  }
  0x27   :  { %917 = vmatpush1.bf16.msra.mxu0 %v4103_v39  ;;  %v4178_v39 = vld [vmem:[%s5871_s1 + $0x370] ss:$20 sps:$4 sm:$0xff]  }
  0x28   :  { %918 = vmatprep.subr.bf16.mxu0 %v4105_v43  ;;  %v4184_v43 = vld [vmem:[%s5871_s1 + $0x398] ss:$20 sps:$4 sm:$0xff]  }
  0x29   :  { %999 = vmatpush1.bf16.msra.mxu1 %v4128_v52  ;;  %v4202_v52 = vld [vmem:[%s5871_s1 + $0x3a0] ss:$20 sps:$4 sm:$0xff]  }
  0x2a   :  { %1000 = vmatprep.subr.bf16.mxu1 %v4131_v54  ;;  %v4207_v54 = vld [vmem:[%s5871_s1 + $0x3cc] ss:$20 sps:$4 sm:$0xff]  }
  0x2b   :  { %919 = vmatpush1.bf16.msra.mxu0 %v4109_v45  ;;  %v4201_v45 = vld [vmem:[%s5871_s1 + $0x37c] ss:$20 sps:$4 sm:$0xff]  }
  0x2c   :  { %920 = vmatprep.subr.bf16.mxu0 %v4111_v49  ;;  %v4204_v49 = vld [vmem:[%s5871_s1 + $0x3a4] ss:$20 sps:$4 sm:$0xff]  }
  0x2d   :  { %1001 = vmatpush1.bf16.msra.mxu1 %v4134_v57  ;;  %v4205_v57 = vld [vmem:[%s5871_s1 + $0x3c8] ss:$20 sps:$4 sm:$0xff]  }
  0x2e   :  { %1002 = vmatprep.subr.bf16.mxu1 %v4137_v58  ;;  %v4212_v58 = vld [vmem:[%s5871_s1 + $0x38] ss:$20 sps:$4 sm:$0xff]  }
  0x2f   :  { %921 = vmatpush1.bf16.msra.mxu0 %v4115_v51  ;;  %v4932_v51 = vpack.c.bf16 %v4796_v5, %v4796_v5  ;;  %v4219_v5 = vld [vmem:[%s5871_s1 + $0x308] ss:$20 sps:$4 sm:$0xff]  }
  0x30   :  { %922 = vmatprep.subr.bf16.mxu0 %v4117_v55  ;;  %v4209_v55 = vld [vmem:[%s5871_s1 + $0x10] ss:$20 sps:$4 sm:$0xff]  }
  0x31   :  { %1003 = vmatpush1.bf16.msra.mxu1 %v4140_v61  ;;  %v4547_v61 = vmov 0  }
  0x32   :  { %1004 = vmatprep.subr.bf16.mxu1 %v4145_v62  ;;  %v4215_v62 = vld [vmem:[%s5871_s1 + $0x60] ss:$20 sps:$4 sm:$0xff]  }
  0x33   :  { %923 = vmatpush1.bf16.msra.mxu0 %v4121_v56  ;;  %v4211_v56 = vld [vmem:[%s5871_s1 + $0x178] ss:$20 sps:$4 sm:$0xff]  }
  0x34   :  { %924 = vmatprep.subr.bf16.mxu0 %v4123_v59  ;;  %v4214_v59 = vld [vmem:[%s5871_s1 + $0x1a0] ss:$20 sps:$4 sm:$0xff]  }
  0x35   :  { %1005 = vmatpush1.bf16.msra.mxu1 %v4147_v2  ;;  %v4216_v2 = vld [vmem:[%s5871_s1 + $0x2e0] ss:$20 sps:$4 sm:$0xff]  }
  0x36   :  { %1006 = vmatprep.subr.bf16.mxu1 %v4151_v3  ;;  %v4221_v3 = vld [vmem:[%s5871_s1 + $0xb0] ss:$20 sps:$4 sm:$0xff]  }
  0x37   :  { %925 = vmatpush1.bf16.msra.mxu0 %v4127_v60  ;;  %v4210_v60 = vld [vmem:[%s5871_s1 + $0x290] ss:$20 sps:$4 sm:$0xff]  }
  0x38   :  { %926 = vmatprep.subr.bf16.mxu0 %v4129_v63  ;;  %v4217_v63 = vld [vmem:[%s5871_s1 + $0x1c8] ss:$20 sps:$4 sm:$0xff]  }
  0x39   :  { %1007 = vmatpush1.bf16.msra.mxu1 %v4153_v7  ;;  %v4226_v7 = vld [vmem:[%s5871_s1 + $0x240] ss:$20 sps:$4 sm:$0xff]  }
  0x3a   :  { %1008 = vmatprep.subr.bf16.mxu1 %v4157_v8  ;;  %v4222_v8 = vld [vmem:[%s5871_s1 + $0x330] ss:$20 sps:$4 sm:$0xff]  }
  0x3b   :  { %927 = vmatpush1.bf16.msra.mxu0 %v4133_v1  ;;  %v4220_v1 = vld [vmem:[%s5871_s1 + $0x1f0] ss:$20 sps:$4 sm:$0xff]  }
  0x3c   :  { %928 = vmatprep.subr.bf16.mxu0 %v4135_v4  ;;  %v4223_v4 = vld [vmem:[%s5871_s1 + $0x218] ss:$20 sps:$4 sm:$0xff]  }
  0x3d   :  { %1009 = vmatpush1.bf16.msra.mxu1 %v4159_v13  ;;  %v4230_v13 = vld [vmem:[%s5871_s1 + $0x128] ss:$20 sps:$4 sm:$0xff]  }
  0x3e   :  { %1010 = vmatprep.subr.bf16.mxu1 %v4163_v14  ;;  %v4235_v14 = vld [vmem:[%s5873_s3 + $0x4] ss:$20 sps:$4 sm:$0xff]  }
  0x3f   :  { %929 = vmatpush1.bf16.msra.mxu0 %v4139_v6  ;;  %v4224_v6 = vld [vmem:[%s5871_s1 + $0xd8] ss:$20 sps:$4 sm:$0xff]  }
  0x40   :  { %939 = vmatprep.subr.bf16.mxu0 %v4144_v9  ;;  %v4227_v9 = vld [vmem:[%s5871_s1 + $0x100] ss:$20 sps:$4 sm:$0xff]  }
  0x41   :  { %1011 = vmatpush1.bf16.msra.mxu1 %v4165_v18  ;;  %v4231_v18 = vld [vmem:[%s5871_s1 + $0x3a8] ss:$20 sps:$4 sm:$0xff]  }
  0x42   :  { %931 = vmatmul.mubr.bf16.vlgmr.msra.gmra.mrb[0].mxu0 %v4815_v12  ;;  %1021 = vmatprep.subr.bf16.mxu1 %v4171_v19  ;;  %v4239_v19 = vld [vmem:[%s5873_s3 + $0x28] ss:$20 sps:$4 sm:$0xff]  }
  0x43   :  { %940 = vmatpush1.bf16.msra.mxu0 %v4142_v11  ;;  %3596 = vmatprep.mubr.msk.bf16.mxu0 %vm894_vm0, %v4826_v16  ;;  %v4225_v11 = vld [vmem:[%s5871_s1 + $0x358] ss:$20 sps:$4 sm:$0xff]  }
  0x44   :  { %941 = vmatprep.subr.bf16.mxu0 %v4150_v15  ;;  %1013 = vmatmul.mubr.bf16.vlgmr.msra.gmra.mrb[0].mxu1 %v4815_v12  ;;  %v4228_v15 = vld [vmem:[%s5871_s1 + $0x380] ss:$20 sps:$4 sm:$0xff]  }
  0x45   :  { %1022 = vmatpush1.bf16.msra.mxu1 %v4169_v22  ;;  %3597 = vmatprep.mubr.msk.bf16.mxu1 %vm894_vm0, %v4826_v16  ;;  %v4238_v22 = vld [vmem:[%s5873_s3 + $0xc] ss:$20 sps:$4 sm:$0xff]  }
  0x46   :  { %1023 = vmatprep.subr.bf16.mxu1 %v4177_v23  ;;  %v4253_v23 = vld [vmem:[%s5873_s3 + $0x7c] ss:$20 sps:$4 sm:$0xff]  }
  0x47   :  { %942 = vmatpush1.bf16.msra.mxu0 %v4148_v17  ;;  %v4241_v17 = vld [vmem:[%s5873_s3 + $0x2c] ss:$20 sps:$4 sm:$0xff]  }
  0x48   :  { %943 = vmatprep.subr.bf16.mxu0 %v4156_v20  ;;  %v4247_v20 = vld [vmem:[%s5873_s3 + $0x54] ss:$20 sps:$4 sm:$0xff]  }
  0x49   :  { %1024 = vmatpush1.bf16.msra.mxu1 %v4175_v26  ;;  %v4251_v26 = vld [vmem:[%s5873_s3 + $0x78] ss:$20 sps:$4 sm:$0xff]  }
  0x4a   :  { %1025 = vmatprep.subr.bf16.mxu1 %v4183_v27  ;;  %v4259_v27 = vld [vmem:[%s5873_s3 + $0xa4] ss:$20 sps:$4 sm:$0xff]  }
  0x4b   :  { %944 = vmatpush1.bf16.msra.mxu0 %v4154_v21  ;;  %v4232_v21 = vld [vmem:[%s5871_s1 + $0x3d0] ss:$20 sps:$4 sm:$0xff]  }
  0x4c   :  { %945 = vmatprep.subr.bf16.mxu0 %v4162_v24  ;;  %v4236_v24 = vld [vmem:[%s5873_s3 + $0x8] ss:$20 sps:$4 sm:$0xff]  }
  0x4d   :  { %1026 = vmatpush1.bf16.msra.mxu1 %v4181_v31  ;;  %v4257_v31 = vld [vmem:[%s5873_s3 + $0xa0] ss:$20 sps:$4 sm:$0xff]  }
  0x4e   :  { %1027 = vmatprep.subr.bf16.mxu1 %v4189_v32  ;;  %v4265_v32 = vld [vmem:[%s5873_s3 + $0xcc] ss:$20 sps:$4 sm:$0xff]  }
  0x4f   :  { %946 = vmatpush1.bf16.msra.mxu0 %v4160_v25  ;;  %v4244_v25 = vld [vmem:[%s5873_s3 + $0x34] ss:$20 sps:$4 sm:$0xff]  }
  0x50   :  { %947 = vmatprep.subr.bf16.mxu0 %v4168_v28  ;;  %v4242_v28 = vld [vmem:[%s5873_s3 + $0x30] ss:$20 sps:$4 sm:$0xff]  }
  0x51   :  { %1028 = vmatpush1.bf16.msra.mxu1 %v4187_v36  ;;  %v4263_v36 = vld [vmem:[%s5873_s3 + $0xc8] ss:$20 sps:$4 sm:$0xff]  }
  0x52   :  { %1029 = vmatprep.subr.bf16.mxu1 %v4195_v37  ;;  %v4271_v37 = vld [vmem:[%s5873_s3 + $0xf4] ss:$20 sps:$4 sm:$0xff]  }
  0x53   :  { %948 = vmatpush1.bf16.msra.mxu0 %v4166_v29  ;;  %v4250_v29 = vld [vmem:[%s5873_s3 + $0x5c] ss:$20 sps:$4 sm:$0xff]  }
  0x54   :  { %949 = vmatprep.subr.bf16.mxu0 %v4174_v33  ;;  %v4248_v33 = vld [vmem:[%s5873_s3 + $0x58] ss:$20 sps:$4 sm:$0xff]  }
  0x55   :  { %1030 = vmatpush1.bf16.msra.mxu1 %v4193_v40  ;;  %v4269_v40 = vld [vmem:[%s5873_s3 + $0xf0] ss:$20 sps:$4 sm:$0xff]  }
  0x56   :  { %1031 = vmatprep.subr.bf16.mxu1 %v4198_v41  ;;  %v4277_v41 = vld [vmem:[%s5873_s3 + $0x11c] ss:$20 sps:$4 sm:$0xff]  }
  0x57   :  { %950 = vmatpush1.bf16.msra.mxu0 %v4172_v34  ;;  %v4256_v34 = vld [vmem:[%s5873_s3 + $0x84] ss:$20 sps:$4 sm:$0xff]  }
  0x58   :  { %951 = vmatprep.subr.bf16.mxu0 %v4180_v38  ;;  %v4254_v38 = vld [vmem:[%s5873_s3 + $0x80] ss:$20 sps:$4 sm:$0xff]  }
  0x59   :  { %1032 = vmatpush1.bf16.msra.mxu1 %v4196_v44  ;;  %v4275_v44 = vld [vmem:[%s5873_s3 + $0x118] ss:$20 sps:$4 sm:$0xff]  }
  0x5a   :  { %1033 = vmatprep.subr.bf16.mxu1 %v4201_v45  ;;  %v4283_v45 = vld [vmem:[%s5873_s3 + $0x144] ss:$20 sps:$4 sm:$0xff]  }
  0x5b   :  { %952 = vmatpush1.bf16.msra.mxu0 %v4178_v39  ;;  %v4262_v39 = vld [vmem:[%s5873_s3 + $0xac] ss:$20 sps:$4 sm:$0xff]  }
  0x5c   :  { %953 = vmatprep.subr.bf16.mxu0 %v4186_v42  ;;  %v4260_v42 = vld [vmem:[%s5873_s3 + $0xa8] ss:$20 sps:$4 sm:$0xff]  }
  0x5d   :  { %1034 = vmatpush1.bf16.msra.mxu1 %v4199_v47  ;;  %v4274_v47 = vld [vmem:[%s5873_s3 + $0xfc] ss:$20 sps:$4 sm:$0xff]  }
  0x5e   :  { %1035 = vmatprep.subr.bf16.mxu1 %v4204_v49  ;;  %v4289_v49 = vld [vmem:[%s5873_s3 + $0x16c] ss:$20 sps:$4 sm:$0xff]  }
  0x5f   :  { %954 = vmatpush1.bf16.msra.mxu0 %v4184_v43  ;;  %v4268_v43 = vld [vmem:[%s5873_s3 + $0xd4] ss:$20 sps:$4 sm:$0xff]  }
  0x60   :  { %955 = vmatprep.subr.bf16.mxu0 %v4192_v46  ;;  %v4266_v46 = vld [vmem:[%s5873_s3 + $0xd0] ss:$20 sps:$4 sm:$0xff]  }
  0x61   :  { %1036 = vmatpush1.bf16.msra.mxu1 %v4202_v52  ;;  %v4287_v52 = vld [vmem:[%s5873_s3 + $0x168] ss:$20 sps:$4 sm:$0xff]  }
  0x62   :  { %1037 = vmatprep.subr.bf16.mxu1 %v4207_v54  ;;  %v4295_v54 = vld [vmem:[%s5873_s3 + $0x194] ss:$20 sps:$4 sm:$0xff]  }
  0x63   :  { %956 = vmatpush1.bf16.msra.mxu0 %v4190_v48  ;;  %v4281_v48 = vld [vmem:[%s5873_s3 + $0x140] ss:$20 sps:$4 sm:$0xff]  }
  0x64   :  { %3840 = vmatprep.subr.bf16.mxu0 %v4208_v50  ;;  %v4272_v50 = vld [vmem:[%s5873_s3 + $0xf8] ss:$20 sps:$4 sm:$0xff]  }
  0x65   :  { %1038 = vmatpush1.bf16.msra.mxu1 %v4205_v57  ;;  %v4293_v57 = vld [vmem:[%s5873_s3 + $0x190] ss:$20 sps:$4 sm:$0xff]  }
  0x66   :  { %972 = vmatmul.mubr.bf16.vlgmr.msra.gmra.mrb[0].mxu0 %v4932_v51  ;;  %1102 = vmatprep.subr.bf16.mxu1 %v4547_v61 }
  0x67   :  { %3841 = vmatpush3.bf16.msra.mxu0 %v4209_v55  ;;  %1094 = vmatprep.mubr.bf16.mxu0 %v4750_v53  ;;  %v4213_v53 = vld [vmem:[%s5871_s1 + $0x2b8] ss:$20 sps:$4 sm:$0xff]   ;;  %v4278_v55 = vld [vmem:[%s5873_s3 + $0x120] ss:$20 sps:$4 sm:$0xff]  }
  0x68   :  { %3842 = vmatprep.subr.bf16.mxu0 %v4211_v56  ;;  %1054 = vmatmul.mubr.bf16.vlgmr.msra.gmra.mrb[0].mxu1 %v4932_v51  ;;  %v4286_v56 = vld [vmem:[%s5873_s3 + $0x14c] ss:$20 sps:$4 sm:$0xff]  }
  0x69   :  { %1103 = vmatpush1.bf16.msra.mxu1 %v4210_v60  ;;  %3598 = vmatprep.mubr.msk.bf16.mxu1 %vm894_vm0, %v4826_v16  ;;  %v4233_v16 = vld [vmem:[%s5873_s3] ss:$20 sps:$4 sm:$0xff]  }
  0x6a   :  { %1104 = vmatprep.subr.bf16.mxu1 %v4547_v61  ;;  %v4292_v60 = vld [vmem:[%s5873_s3 + $0x174] ss:$20 sps:$4 sm:$0xff]  }
  0x6b   :  { %3843 = vmatpush3.bf16.msra.mxu0 %v4212_v58  ;;  %v4301_v58 = vld [vmem:[%s5873_s3 + $0x1bc] ss:$20 sps:$4 sm:$0xff]  }
  0x6c   :  { %3844 = vmatprep.subr.bf16.mxu0 %v4214_v59  ;;  %v4284_v59 = vld [vmem:[%s5873_s3 + $0x148] ss:$20 sps:$4 sm:$0xff]  }
  0x6d   :  { %1105 = vmatpush1.bf16.msra.mxu1 %v4213_v53  ;;  %v4290_v53 = vld [vmem:[%s5873_s3 + $0x170] ss:$20 sps:$4 sm:$0xff]  }
  0x6e   :  { %1106 = vmatprep.subr.bf16.mxu1 %v4547_v61 }
  0x6f   :  { %3845 = vmatpush3.bf16.msra.mxu0 %v4215_v62  ;;  %v4299_v62 = vld [vmem:[%s5873_s3 + $0x1b8] ss:$20 sps:$4 sm:$0xff]  }
  0x70   :  { %3846 = vmatprep.subr.bf16.mxu0 %v4217_v63  ;;  %v4307_v63 = vld [vmem:[%s5873_s3 + $0x1e4] ss:$20 sps:$4 sm:$0xff]  }
  0x71   :  { %1107 = vmatpush1.bf16.msra.mxu1 %v4216_v2  ;;  %v4313_v2 = vld [vmem:[%s5873_s3 + $0x20c] ss:$20 sps:$4 sm:$0xff]  }
  0x72   :  { %1108 = vmatprep.subr.bf16.mxu1 %v4547_v61 }
  0x73   :  { %3847 = vmatpush3.bf16.msra.mxu0 %v4218_v0  ;;  %v4298_v0 = vld [vmem:[%s5873_s3 + $0x19c] ss:$20 sps:$4 sm:$0xff]  }
  0x74   :  { %3848 = vmatprep.subr.bf16.mxu0 %v4220_v1  ;;  %v4305_v1 = vld [vmem:[%s5873_s3 + $0x1e0] ss:$20 sps:$4 sm:$0xff]  }
  0x75   :  { %1109 = vmatpush1.bf16.msra.mxu1 %v4219_v5  ;;  %v4311_v5 = vld [vmem:[%s5873_s3 + $0x208] ss:$20 sps:$4 sm:$0xff]  }
  0x76   :  { %1110 = vmatprep.subr.bf16.mxu1 %v4547_v61 }
  0x77   :  { %3849 = vmatpush3.bf16.msra.mxu0 %v4221_v3  ;;  %v4296_v3 = vld [vmem:[%s5873_s3 + $0x198] ss:$20 sps:$4 sm:$0xff]  }
  0x78   :  { %3850 = vmatprep.subr.bf16.mxu0 %v4223_v4  ;;  %v4304_v4 = vld [vmem:[%s5873_s3 + $0x1c4] ss:$20 sps:$4 sm:$0xff]  }
  0x79   :  { %1111 = vmatpush1.bf16.msra.mxu1 %v4222_v8  ;;  %v4310_v8 = vld [vmem:[%s5873_s3 + $0x1ec] ss:$20 sps:$4 sm:$0xff]  }
  0x7a   :  { %1112 = vmatprep.subr.bf16.mxu1 %v4547_v61 }
  0x7b   :  { %3851 = vmatpush3.bf16.msra.mxu0 %v4224_v6  ;;  %v4302_v6 = vld [vmem:[%s5873_s3 + $0x1c0] ss:$20 sps:$4 sm:$0xff]  }
  0x7c   :  { %3852 = vmatprep.subr.bf16.mxu0 %v4226_v7  ;;  %v4319_v7 = vld [vmem:[%s5873_s3 + $0x234] ss:$20 sps:$4 sm:$0xff]  }
  0x7d   :  { %1113 = vmatpush1.bf16.msra.mxu1 %v4225_v11  ;;  %v4308_v11 = vld [vmem:[%s5873_s3 + $0x1e8] ss:$20 sps:$4 sm:$0xff]  }
  0x7e   :  { %1114 = vmatprep.subr.bf16.mxu1 %v4547_v61 }
  0x7f   :  { %3853 = vmatpush3.bf16.msra.mxu0 %v4227_v9  ;;  %v4317_v9 = vld [vmem:[%s5873_s3 + $0x230] ss:$20 sps:$4 sm:$0xff]  }
  0x80   :  { %3854 = vmatprep.subr.bf16.mxu0 %v4229_v10  ;;  %v4325_v10 = vld [vmem:[%s5873_s3 + $0x25c] ss:$20 sps:$4 sm:$0xff]  }
  0x81   :  { %1115 = vmatpush1.bf16.msra.mxu1 %v4228_v15  ;;  %v4331_v15 = vld [vmem:[%s5873_s3 + $0x284] ss:$20 sps:$4 sm:$0xff]  }
  0x82   :  { %1116 = vmatprep.subr.bf16.mxu1 %v4547_v61 }
  0x83   :  { %3855 = vmatpush3.bf16.msra.mxu0 %v4230_v13  ;;  %v4316_v13 = vld [vmem:[%s5873_s3 + $0x214] ss:$20 sps:$4 sm:$0xff]  }
  0x84   :  { %2399 = vmatprep.subr.bf16.mxu0 %v4235_v14  ;;  %v4323_v14 = vld [vmem:[%s5873_s3 + $0x258] ss:$20 sps:$4 sm:$0xff]  }
  0x85   :  { %1117 = vmatpush1.bf16.msra.mxu1 %v4231_v18  ;;  %v4320_v18 = vld [vmem:[%s5873_s3 + $0x238] ss:$20 sps:$4 sm:$0xff]  }
  0x86   :  { %1095 = vmatmul.mubr.bf16.vlgmr.msra.gmra.mrb[4].mxu0 %v4815_v12  ;;  %v4245_v12 = vld [vmem:[%s5873_s3 + $0x50] ss:$20 sps:$4 sm:$0xff]   ;;  %1118 = vmatprep.subr.bf16.mxu1 %v4547_v61 }
  0x87   :  { %2400 = vmatpush1.bf16.msra.mxu0 %v4233_v16  ;;  %v4314_v16 = vld [vmem:[%s5873_s3 + $0x210] ss:$20 sps:$4 sm:$0xff]  }
  0x88   :  { %2401 = vmatprep.subr.bf16.mxu0 %v4241_v17  ;;  %v4322_v17 = vld [vmem:[%s5873_s3 + $0x23c] ss:$20 sps:$4 sm:$0xff]  }
  0x89   :  { %1119 = vmatpush1.bf16.msra.mxu1 %v4232_v21  ;;  %v4334_v21 = vld [vmem:[%s5873_s3 + $0x28c] ss:$20 sps:$4 sm:$0xff]  }
  0x8a   :  { %2522 = vmatprep.subr.bf16.mxu1 %v4238_v22  ;;  %v221_v22 = vsub.s32 0, %v4705_v35 }
  0x8b   :  { %2402 = vmatpush1.bf16.msra.mxu0 %v4239_v19  ;;  %v4328_v19 = vld [vmem:[%s5873_s3 + $0x264] ss:$20 sps:$4 sm:$0xff]  }
  0x8c   :  { %2403 = vmatprep.subr.bf16.mxu0 %v4247_v20  ;;  %1135 = vmatmul.mubr.bf16.vlgmr.msra.gmra.mrb[4].mxu1 %v4932_v51  ;;  %v4280_v51 = vld [vmem:[%s5873_s3 + $0x124] ss:$20 sps:$4 sm:$0xff]   ;;  %v4326_v20 = vld [vmem:[%s5873_s3 + $0x260] ss:$20 sps:$4 sm:$0xff]  }
  0x8d   :  { %2523 = vmatpush1.bf16.msra.mxu1 %v4236_v24 }
  0x8e   :  { %2524 = vmatprep.subr.bf16.mxu1 %v4244_v25 }
  0x8f   :  { %2404 = vmatpush1.bf16.msra.mxu0 %v4245_v12  ;;  %v5233_v12 = vld [vmem:[%s5874_s2] sm:$0x1f] }
  0x90   :  { %2405 = vmatprep.subr.bf16.mxu0 %v4253_v23  ;;  %v225_v23 = vsub.s32 1, %v4705_v35  ;;  %v222_v24 = vrot.slane %v5233_v12, %v221_v22 }
  0x91   :  { %2525 = vmatpush1.bf16.msra.mxu1 %v4242_v28 }
  0x92   :  { %2526 = vmatprep.subr.bf16.mxu1 %v4250_v29  ;;  %v226_v25 = vrot.slane %v5233_v12, %v225_v23  ;;  %v233_v29 = vsub.s32 3, %v4705_v35 }
  0x93   :  { %2406 = vmatpush1.bf16.msra.mxu0 %v4251_v26 }
  0x94   :  { %2407 = vmatprep.subr.bf16.mxu0 %v4259_v27 }
  0x95   :  { %2527 = vmatpush1.bf16.msra.mxu1 %v4248_v33 }
  0x96   :  { %2528 = vmatprep.subr.bf16.mxu1 %v4256_v34 }
  0x97   :  { %2408 = vmatpush1.bf16.msra.mxu0 %v4257_v31 }
  0x98   :  { %2409 = vmatprep.subr.bf16.mxu0 %v4265_v32 }
  0x99   :  { %2529 = vmatpush1.bf16.msra.mxu1 %v4254_v38 }
  0x9a   :  { %2530 = vmatprep.subr.bf16.mxu1 %v4262_v39  ;;  %v4329_v39 = vld [vmem:[%s5873_s3 + $0x280] ss:$20 sps:$4 sm:$0xff]  }
  0x9b   :  { %2410 = vmatpush1.bf16.msra.mxu0 %v4263_v36 }
  0x9c   :  { %2411 = vmatprep.subr.bf16.mxu0 %v4271_v37  ;;  %v234_v37 = vrot.slane %v5233_v12, %v233_v29 }
  0x9d   :  { %2531 = vmatpush1.bf16.msra.mxu1 %v4260_v42  ;;  %v4337_v42 = vld [vmem:[%s5873_s3 + $0x2ac] ss:$20 sps:$4 sm:$0xff]  }
  0x9e   :  { %2532 = vmatprep.subr.bf16.mxu1 %v4268_v43  ;;  %v4340_v43 = vld [vmem:[%s5873_s3 + $0x2b4] ss:$20 sps:$4 sm:$0xff]  }
  0x9f   :  { %2412 = vmatpush1.bf16.msra.mxu0 %v4269_v40  ;;  %v4332_v40 = vld [vmem:[%s5873_s3 + $0x288] ss:$20 sps:$4 sm:$0xff]  }
  0xa0   :  { %2413 = vmatprep.subr.bf16.mxu0 %v4277_v41 }
  0xa1   :  { %2533 = vmatpush1.bf16.msra.mxu1 %v4266_v46 }
  0xa2   :  { %2534 = vmatprep.subr.bf16.mxu1 %v4274_v47 }
  0xa3   :  { %2414 = vmatpush1.bf16.msra.mxu0 %v4275_v44 }
  0xa4   :  { %2415 = vmatprep.subr.bf16.mxu0 %v4283_v45 }
  0xa5   :  { %2535 = vmatpush1.bf16.msra.mxu1 %v4272_v50 }
  0xa6   :  { %2536 = vmatprep.subr.bf16.mxu1 %v4280_v51  ;;  %v4343_v51 = vld [vmem:[%s5873_s3 + $0x2d4] ss:$20 sps:$4 sm:$0xff]  }
  0xa7   :  { %2416 = vmatpush1.bf16.msra.mxu0 %v4281_v48  ;;  %v4335_v48 = vld [vmem:[%s5873_s3 + $0x2a8] ss:$20 sps:$4 sm:$0xff]  }
  0xa8   :  { %2417 = vmatprep.subr.bf16.mxu0 %v4289_v49  ;;  %v4338_v49 = vld [vmem:[%s5873_s3 + $0x2b0] ss:$20 sps:$4 sm:$0xff]  }
  0xa9   :  { %2537 = vmatpush1.bf16.msra.mxu1 %v4278_v55 }
  0xaa   :  { %2538 = vmatprep.subr.bf16.mxu1 %v4286_v56  ;;  %v4341_v56 = vld [vmem:[%s5873_s3 + $0x2d0] ss:$20 sps:$4 sm:$0xff]  }
  0xab   :  { %2418 = vmatpush1.bf16.msra.mxu0 %v4287_v52  ;;  %v4346_v52 = vld [vmem:[%s5873_s3 + $0x2dc] ss:$20 sps:$4 sm:$0xff]  }
  0xac   :  { %2419 = vmatprep.subr.bf16.mxu0 %v4295_v54 }
  0xad   :  { %2539 = vmatpush1.bf16.msra.mxu1 %v4284_v59  ;;  %v4352_v59 = vld [vmem:[%s5873_s3 + $0x304] ss:$20 sps:$4 sm:$0xff]  }
  0xae   :  { %2540 = vmatprep.subr.bf16.mxu1 %v4292_v60  ;;  %v4347_v60 = vld [vmem:[%s5873_s3 + $0x2f8] ss:$20 sps:$4 sm:$0xff]  }
  0xaf   :  { %2420 = vmatpush1.bf16.msra.mxu0 %v4293_v57  ;;  %v4344_v57 = vld [vmem:[%s5873_s3 + $0x2d8] ss:$20 sps:$4 sm:$0xff]  }
  0xb0   :  { %2421 = vmatprep.subr.bf16.mxu0 %v4301_v58  ;;  %v4349_v58 = vld [vmem:[%s5873_s3 + $0x2fc] ss:$20 sps:$4 sm:$0xff]  }
  0xb1   :  { %2541 = vmatpush1.bf16.msra.mxu1 %v4290_v53  ;;  %v4358_v53 = vld [vmem:[%s5873_s3 + $0x32c] ss:$20 sps:$4 sm:$0xff]  }
  0xb2   :  { %2542 = vmatprep.subr.bf16.mxu1 %v4298_v0  ;;  %v4353_v0 = vld [vmem:[%s5873_s3 + $0x320] ss:$20 sps:$4 sm:$0xff]  }
  0xb3   :  { %2422 = vmatpush1.bf16.msra.mxu0 %v4299_v62  ;;  %v4350_v62 = vld [vmem:[%s5873_s3 + $0x300] ss:$20 sps:$4 sm:$0xff]  }
  0xb4   :  { %2423 = vmatprep.subr.bf16.mxu0 %v4307_v63  ;;  %v4355_v63 = vld [vmem:[%s5873_s3 + $0x324] ss:$20 sps:$4 sm:$0xff]  }
  0xb5   :  { %2543 = vmatpush1.bf16.msra.mxu1 %v4296_v3  ;;  %v4364_v3 = vld [vmem:[%s5873_s3 + $0x354] ss:$20 sps:$4 sm:$0xff]  }
  0xb6   :  { %2544 = vmatprep.subr.bf16.mxu1 %v4304_v4  ;;  %v4359_v4 = vld [vmem:[%s5873_s3 + $0x348] ss:$20 sps:$4 sm:$0xff]  }
  0xb7   :  { %2424 = vmatpush1.bf16.msra.mxu0 %v4305_v1  ;;  %v4356_v1 = vld [vmem:[%s5873_s3 + $0x328] ss:$20 sps:$4 sm:$0xff]  }
  0xb8   :  { %2425 = vmatprep.subr.bf16.mxu0 %v4313_v2  ;;  %v4361_v2 = vld [vmem:[%s5873_s3 + $0x34c] ss:$20 sps:$4 sm:$0xff]  }
  0xb9   :  { %2545 = vmatpush1.bf16.msra.mxu1 %v4302_v6  ;;  %v4367_v6 = vld [vmem:[%s5873_s3 + $0x374] ss:$20 sps:$4 sm:$0xff]  }
  0xba   :  { %2546 = vmatprep.subr.bf16.mxu1 %v4310_v8  ;;  %v4365_v8 = vld [vmem:[%s5873_s3 + $0x370] ss:$20 sps:$4 sm:$0xff]  }
  0xbb   :  { %2426 = vmatpush1.bf16.msra.mxu0 %v4311_v5  ;;  %v4362_v5 = vld [vmem:[%s5873_s3 + $0x350] ss:$20 sps:$4 sm:$0xff]  }
  0xbc   :  { %2427 = vmatprep.subr.bf16.mxu0 %v4319_v7  ;;  %v4370_v7 = vld [vmem:[%s5873_s3 + $0x37c] ss:$20 sps:$4 sm:$0xff]  }
  0xbd   :  { %2547 = vmatpush1.bf16.msra.mxu1 %v4308_v11  ;;  %v4376_v11 = vld [vmem:[%s5873_s3 + $0x3a4] ss:$20 sps:$4 sm:$0xff]  }
  0xbe   :  { %2548 = vmatprep.subr.bf16.mxu1 %v4316_v13  ;;  %v4371_v13 = vld [vmem:[%s5873_s3 + $0x398] ss:$20 sps:$4 sm:$0xff]  }
  0xbf   :  { %2428 = vmatpush1.bf16.msra.mxu0 %v4317_v9  ;;  %v4368_v9 = vld [vmem:[%s5873_s3 + $0x378] ss:$20 sps:$4 sm:$0xff]  }
  0xc0   :  { %2429 = vmatprep.subr.bf16.mxu0 %v4325_v10  ;;  %v4373_v10 = vld [vmem:[%s5873_s3 + $0x39c] ss:$20 sps:$4 sm:$0xff]  }
  0xc1   :  { %2549 = vmatpush1.bf16.msra.mxu1 %v4314_v16  ;;  %v237_v16 = vsub.s32 4, %v4705_v35 }
  0xc2   :  { %2550 = vmatprep.subr.bf16.mxu1 %v4322_v17  ;;  %v4379_v17 = vld [vmem:[%s5873_s3 + $0x3c4] ss:$20 sps:$4 sm:$0xff]  }
  0xc3   :  { %2430 = vmatpush1.bf16.msra.mxu0 %v4323_v14  ;;  %v4374_v14 = vld [vmem:[%s5873_s3 + $0x3a0] ss:$20 sps:$4 sm:$0xff]  }
  0xc4   :  { %2440 = vmatprep.subr.bf16.mxu0 %v4331_v15 }
  0xc5   :  { %2551 = vmatpush1.bf16.msra.mxu1 %v4320_v18  ;;  %v4382_v18 = vld [vmem:[%s5873_s3 + $0x3cc] ss:$20 sps:$4 sm:$0xff]  }
  0xc6   :  { %2552 = vmatprep.subr.bf16.mxu1 %v4328_v19 }
  0xc9   :  { %2553 = vmatpush1.bf16.msra.mxu1 %v4326_v20 }
  0xca   :  { %2563 = vmatprep.subr.bf16.mxu1 %v4334_v21 }
 0x139   :  { %v973_v26 = vpop.f32.mrb[0].mxu0 }
 0x13a   :  { %v4020_v27 = vadd.f32 %v973_v26, %v222_v24  ;;  %v975_v28 = vpop.f32.mrb[1].mxu0  ;;  %v238_v26 = vrot.slane %v5233_v12, %v237_v16 }
 0x13b   :  { %v4021_v31 = vadd.f32 %v975_v28, %v226_v25  ;;  %v977_v32 = vpop.f32.mrb[2].mxu0  ;;  %v5262_v44 = vpop.f32.mrb[0].mxu1  ;;  %v4377_v25 = vld [vmem:[%s5873_s3 + $0x3c0] ss:$20 sps:$4 sm:$0xff]  }
 0x13c   :  { %v1142_v33 = vmax.f32 %v4020_v27, 0.0  ;;  %v978_v34 = vpop.f32.mrb[3].mxu0  ;;  %v1057_v45 = vpop.f32.mrb[1].mxu1  ;;  %v4380_v27 = vld [vmem:[%s5873_s3 + $0x3c8] ss:$20 sps:$4 sm:$0xff]  }
 0x13d   :  { %v1143_v36 = vmax.f32 %v4021_v31, 0.0  ;;  %v4023_v46 = vadd.f32 %v1057_v45, %v234_v37  ;;  %v1059_v47 = vpop.f32.mrb[2].mxu1  ;;  %v4385_v28 = vld [vmem:[%s5873_s3 + $0x3ec] ss:$20 sps:$4 sm:$0xff]   ;;  %v4388_v31 = vld [vmem:[%s5873_s3 + $0x3f4] ss:$20 sps:$4 sm:$0xff]  }
 0x13e   :  { %v5254_v41 = vpack.c.bf16 %v1142_v33, %v1142_v33  ;;  %v1060_v50 = vpop.f32.mrb[3].mxu1  ;;  %v4383_v32 = vld [vmem:[%s5873_s3 + $0x3e8] ss:$20 sps:$4 sm:$0xff]   ;;  %v4386_v33 = vld [vmem:[%s5873_s3 + $0x3f0] ss:$20 sps:$4 sm:$0xff]  }
 0x13f   :  { %v5246_v38 = vpack.c.bf16 %v1143_v36, %v1143_v36  ;;  %v1145_v54 = vmax.f32 %v4023_v46, 0.0  ;;  %v4391_v36 = vld [vmem:[%s5873_s3 + $0x414] ss:$20 sps:$4 sm:$0xff]   ;;  %v4394_v37 = vld [vmem:[%s5873_s3 + $0x41c] ss:$20 sps:$4 sm:$0xff]  }
 0x140   :  { %v4397_v46 = vld [vmem:[%s5873_s3 + $0x43c] ss:$20 sps:$4 sm:$0xff]   ;;  %v4400_v50 = vld [vmem:[%s5873_s3 + $0x444] ss:$20 sps:$4 sm:$0xff]  }
 0x141   :  { %2431 = vmatprep.mubr.bf16.mxu0 %v5246_v38  ;;  %2554 = vmatprep.mubr.bf16.mxu1 %v5246_v38  ;;  %v5280_v55 = vpack.c.bf16 %v1145_v54, %v1145_v54  ;;  %v4403_v54 = vld [vmem:[%s5873_s3 + $0x464] ss:$20 sps:$4 sm:$0xff]  }
 0x142   :  { %2432 = vmatmul.mubr.bf16.vlgmr.msra.gmra.mrb[8].mxu0 %v5254_v41  ;;  %2555 = vmatmul.mubr.bf16.vlgmr.msra.gmra.mrb[8].mxu1 %v5254_v41 }
 0x143   :  { %2441 = vmatpush1.bf16.msra.mxu0 %v4329_v39  ;;  %2564 = vmatpush1.bf16.msra.mxu1 %v4332_v40  ;;  %v4389_v40 = vld [vmem:[%s5873_s3 + $0x410] ss:$20 sps:$4 sm:$0xff]  }
 0x144   :  { %2442 = vmatprep.subr.bf16.mxu0 %v4337_v42  ;;  %2565 = vmatprep.subr.bf16.mxu1 %v4340_v43  ;;  %v4392_v42 = vld [vmem:[%s5873_s3 + $0x418] ss:$20 sps:$4 sm:$0xff]  }
 0x145   :  { %2472 = vmatprep.mubr.bf16.mxu0 %v5280_v55  ;;  %2595 = vmatprep.mubr.bf16.mxu1 %v5280_v55 }
 0x147   :  { %2443 = vmatpush1.bf16.msra.mxu0 %v4335_v48  ;;  %2566 = vmatpush1.bf16.msra.mxu1 %v4338_v49  ;;  %v229_v48 = vsub.s32 2, %v4705_v35  ;;  %v4535_v35 = vld [vmem:[%s5877_s6] sm:$0xff]  }
 0x148   :  { %2444 = vmatprep.subr.bf16.mxu0 %v4343_v51  ;;  %2567 = vmatprep.subr.bf16.mxu1 %v4346_v52  ;;  %v4395_v51 = vld [vmem:[%s5873_s3 + $0x438] ss:$20 sps:$4 sm:$0xff]   ;;  %v4398_v52 = vld [vmem:[%s5873_s3 + $0x440] ss:$20 sps:$4 sm:$0xff]  }
 0x14b   :  { %2445 = vmatpush1.bf16.msra.mxu0 %v4341_v56  ;;  %2568 = vmatpush1.bf16.msra.mxu1 %v4344_v57  ;;  %v4406_v56 = vld [vmem:[%s5873_s3 + $0x46c] ss:$20 sps:$4 sm:$0xff]  }
 0x14c   :  { %2446 = vmatprep.subr.bf16.mxu0 %v4349_v58  ;;  %2569 = vmatprep.subr.bf16.mxu1 %v4352_v59  ;;  %v4401_v57 = vld [vmem:[%s5873_s3 + $0x460] ss:$20 sps:$4 sm:$0xff]   ;;  %v4404_v58 = vld [vmem:[%s5873_s3 + $0x468] ss:$20 sps:$4 sm:$0xff]  }
 0x14d   :  { %v4409_v59 = vld [vmem:[%s5873_s3 + $0x48c] ss:$20 sps:$4 sm:$0xff]  }
 0x14f   :  { %2447 = vmatpush1.bf16.msra.mxu0 %v4347_v60  ;;  %2570 = vmatpush1.bf16.msra.mxu1 %v4350_v62  ;;  %v4412_v60 = vld [vmem:[%s5873_s3 + $0x494] ss:$20 sps:$4 sm:$0xff]  }
 0x150   :  { %2448 = vmatprep.subr.bf16.mxu0 %v4355_v63  ;;  %2571 = vmatprep.subr.bf16.mxu1 %v4358_v53  ;;  %v4407_v62 = vld [vmem:[%s5873_s3 + $0x488] ss:$20 sps:$4 sm:$0xff]   ;;  %v4410_v63 = vld [vmem:[%s5873_s3 + $0x490] ss:$20 sps:$4 sm:$0xff]  }
 0x151   :  { %v4415_v53 = vld [vmem:[%s5873_s3 + $0x4b4] ss:$20 sps:$4 sm:$0xff]  }
 0x153   :  { %2449 = vmatpush1.bf16.msra.mxu0 %v4353_v0  ;;  %2572 = vmatpush1.bf16.msra.mxu1 %v4356_v1  ;;  %v230_v0 = vrot.slane %v5233_v12, %v229_v48  ;;  %v4418_v1 = vld [vmem:[%s5873_s3 + $0x4bc] ss:$20 sps:$4 sm:$0xff]  }
 0x154   :  { %2450 = vmatprep.subr.bf16.mxu0 %v4361_v2  ;;  %2573 = vmatprep.subr.bf16.mxu1 %v4364_v3  ;;  %v4413_v2 = vld [vmem:[%s5873_s3 + $0x4b0] ss:$20 sps:$4 sm:$0xff]   ;;  %v4416_v3 = vld [vmem:[%s5873_s3 + $0x4b8] ss:$20 sps:$4 sm:$0xff]  }
 0x155   :  { %v4421_v12 = vld [vmem:[%s5873_s3 + $0x4dc] ss:$20 sps:$4 sm:$0xff]  }
 0x157   :  { %2451 = vmatpush1.bf16.msra.mxu0 %v4359_v4  ;;  %2574 = vmatpush1.bf16.msra.mxu1 %v4362_v5  ;;  %v4022_v4 = vadd.f32 %v5262_v44, %v230_v0  ;;  %v4424_v5 = vld [vmem:[%s5873_s3 + $0x4e4] ss:$20 sps:$4 sm:$0xff]   ;;  %v4422_v44 = vld [vmem:[%s5873_s3 + $0x4e0] ss:$20 sps:$4 sm:$0xff]   ;;  %v4474_v0 = vld [vmem:[%s5873_s3 + $0x308] ss:$20 sps:$4 sm:$0xff]  }
 0x158   :  { %2452 = vmatprep.subr.bf16.mxu0 %v4367_v6  ;;  %2575 = vmatprep.subr.bf16.mxu1 %v4370_v7  ;;  %v4419_v6 = vld [vmem:[%s5873_s3 + $0x4d8] ss:$20 sps:$4 sm:$0xff]  }
 0x159   :  { %v3856_v15 = vpop.f32.mrb[4].mxu0  ;;  %v1144_v7 = vmax.f32 %v4022_v4, 0.0  ;;  %v4478_v4 = vld [vmem:[%s5873_s3 + $0x330] ss:$20 sps:$4 sm:$0xff]  }
 0x15a   :  { %v3857_v19 = vpop.f32.mrb[5].mxu0 }
 0x15b   :  { %2453 = vmatpush1.bf16.msra.mxu0 %v4365_v8  ;;  %2576 = vmatpush1.bf16.msra.mxu1 %v4368_v9  ;;  %v3858_v20 = vadd.f32 %v3857_v19, %v3856_v15  ;;  %v3859_v21 = vpop.f32.mrb[6].mxu0  ;;  %v4427_v8 = vld [vmem:[%s5873_s3 + $0x504] ss:$20 sps:$4 sm:$0xff]   ;;  %v4430_v9 = vld [vmem:[%s5873_s3 + $0x50c] ss:$20 sps:$4 sm:$0xff]  }
 0x15c   :  { %2454 = vmatprep.subr.bf16.mxu0 %v4373_v10  ;;  %2577 = vmatprep.subr.bf16.mxu1 %v4376_v11  ;;  %v3860_v24 = vpop.f32.mrb[7].mxu0  ;;  %v4425_v10 = vld [vmem:[%s5873_s3 + $0x500] ss:$20 sps:$4 sm:$0xff]   ;;  %v4428_v11 = vld [vmem:[%s5873_s3 + $0x508] ss:$20 sps:$4 sm:$0xff]  }
 0x15d   :  { %v1097_v34 = vadd.f32 %v3858_v20, %v238_v26  ;;  %v4436_v15 = vld [vmem:[%s5873_s3 + $0x534] ss:$20 sps:$4 sm:$0xff]   ;;  %v4442_v20 = vld [vmem:[%s5873_s3 + $0x55c] ss:$20 sps:$4 sm:$0xff]   ;;  %v4440_v24 = vld [vmem:[%s5873_s3 + $0x558] ss:$20 sps:$4 sm:$0xff]  }
 0x15e   :  { %v4439_v19 = vld [vmem:[%s5873_s3 + $0x554] ss:$20 sps:$4 sm:$0xff]   ;;  %v4437_v21 = vld [vmem:[%s5873_s3 + $0x550] ss:$20 sps:$4 sm:$0xff]   ;;  %v4443_v26 = vld [vmem:[%s5873_s3 + $0x578] ss:$20 sps:$4 sm:$0xff]  }
 0x15f   :  { %2455 = vmatpush1.bf16.msra.mxu0 %v4371_v13  ;;  %2578 = vmatpush1.bf16.msra.mxu1 %v4374_v14  ;;  %v1136_v39 = vpop.f32.mrb[4].mxu1  ;;  %v5469_v13 = vpack.c.bf16 %v1144_v7, %v1144_v7  ;;  %v4433_v14 = vld [vmem:[%s5873_s3 + $0x52c] ss:$20 sps:$4 sm:$0xff]  }
 0x160   :  { %2456 = vmatprep.subr.bf16.mxu0 %v4379_v17  ;;  %2579 = vmatprep.subr.bf16.mxu1 %v4382_v18  ;;  %v5390_v43 = vadd.f32 %v1136_v39, %v1097_v34  ;;  %v1138_v45 = vpop.f32.mrb[5].mxu1  ;;  %v4431_v17 = vld [vmem:[%s5873_s3 + $0x528] ss:$20 sps:$4 sm:$0xff]   ;;  %v4434_v18 = vld [vmem:[%s5873_s3 + $0x530] ss:$20 sps:$4 sm:$0xff]  }
 0x161   :  { %v1139_v47 = vpop.f32.mrb[6].mxu1  ;;  %v4449_v34 = vld [vmem:[%s5873_s3 + $0x5a0] ss:$20 sps:$4 sm:$0xff]  }
 0x162   :  { %v1140_v49 = vpop.f32.mrb[7].mxu1  ;;  %v1146_v45 = vmax.f32 %v5390_v43, 0.0  ;;  %v4461_v43 = vld [vmem:[%s5873_s3 + $0x10] ss:$20 sps:$4 sm:$0xff]   ;;  %v4483_v7 = vld [vmem:[%s5873_s3 + $0x240] ss:$20 sps:$4 sm:$0xff]  }
 0x163   :  { %2457 = vmatpush1.bf16.msra.mxu0 %v4377_v25  ;;  %2580 = vmatpush1.bf16.msra.mxu1 %v4380_v27  ;;  %v4445_v25 = vld [vmem:[%s5873_s3 + $0x57c] ss:$20 sps:$4 sm:$0xff]   ;;  %v4446_v27 = vld [vmem:[%s5873_s3 + $0x580] ss:$20 sps:$4 sm:$0xff]  }
 0x164   :  { %2458 = vmatprep.subr.bf16.mxu0 %v4385_v28  ;;  %2581 = vmatprep.subr.bf16.mxu1 %v4388_v31  ;;  %v4451_v28 = vld [vmem:[%s5873_s3 + $0x5a4] ss:$20 sps:$4 sm:$0xff]   ;;  %v4454_v31 = vld [vmem:[%s5873_s3 + $0x5ac] ss:$20 sps:$4 sm:$0xff]  }
 0x165   :  { %v4459_v49 = vld [vmem:[%s5873_s3 + $0x150] ss:$20 sps:$4 sm:$0xff]  }
 0x167   :  { %2459 = vmatpush1.bf16.msra.mxu0 %v4383_v32  ;;  %2582 = vmatpush1.bf16.msra.mxu1 %v4386_v33  ;;  %v1374_v32 = vld [vmem:[%s5873_s3 + $0x5c8] sm:$0xff]  ;;  %v1375_v33 = vld [vmem:[%s5873_s3 + $0x5d0] sm:$0xff] }
 0x168   :  { %2460 = vmatprep.subr.bf16.mxu0 %v4391_v36  ;;  %2583 = vmatprep.subr.bf16.mxu1 %v4394_v37  ;;  %v4452_v36 = vld [vmem:[%s5873_s3 + $0x5a8] ss:$20 sps:$4 sm:$0xff]   ;;  %v3785_v37 = vcombine.high %v1374_v32, %v1374_v32  ;;  %v3787_v39 = vcombine.high %v1375_v33, %v1375_v33 }
 0x16b   :  { %2461 = vmatpush1.bf16.msra.mxu0 %v4389_v40  ;;  %2584 = vmatpush1.bf16.msra.mxu1 %v4392_v42  ;;  %v3784_v40 = vcombine.low %v1374_v32, %v1374_v32  ;;  %v3786_v42 = vcombine.low %v1375_v33, %v1375_v33  ;;  %v4513_v32 = vld [vmem:[%s5875_s5 + $0x60] sm:$0xff]  }
 0x16c   :  { %2462 = vmatprep.subr.bf16.mxu0 %v4397_v46  ;;  %2585 = vmatprep.subr.bf16.mxu1 %v4400_v50  ;;  %v4460_v50 = vld [vmem:[%s5873_s3 + $0x3d0] ss:$20 sps:$4 sm:$0xff]  }
 0x16d   :  { %v2385_v46 = vsel %vm2383_vm1, %v3784_v40, 0  ;;  %v2391_v47 = vsel %vm2383_vm1, %v3786_v42, 0  ;;  %v4495_v33 = vld [vmem:[%s5873_s3 + $0x5b0] ss:$20 sps:$4 sm:$0xff]   ;;  %v4519_v42 = vld [vmem:[%s5875_s5 + $0x28] sm:$0xff]  }
 0x16e   :  { %v4498_v40 = vld [vmem:[%s5875_s5 + $0xc0] sm:$0xff]  }
 0x16f   :  { %2463 = vmatpush1.bf16.msra.mxu0 %v4395_v51  ;;  %2586 = vmatpush1.bf16.msra.mxu1 %v4398_v52  ;;  %v5540_v51 = vpack.c.bf16 %v1146_v45, %v1146_v45  ;;  %v4462_v52 = vld [vmem:[%s5873_s3 + $0x290] ss:$20 sps:$4 sm:$0xff]  }
 0x170   :  { %2464 = vmatprep.subr.bf16.mxu0 %v4403_v54  ;;  %2587 = vmatprep.subr.bf16.mxu1 %v4406_v56  ;;  %v4463_v54 = vld [vmem:[%s5873_s3 + $0x178] ss:$20 sps:$4 sm:$0xff]   ;;  %v4500_v45 = vld [vmem:[%s5875_s5 + $0x80] sm:$0xff]  }
 0x171   :  { %v4464_v56 = vld [vmem:[%s5873_s3 + $0x3f8] ss:$20 sps:$4 sm:$0xff]  }
 0x173   :  { %2465 = vmatpush1.bf16.msra.mxu0 %v4401_v57  ;;  %2588 = vmatpush1.bf16.msra.mxu1 %v4404_v58  ;;  %v4465_v57 = vld [vmem:[%s5873_s3 + $0x38] ss:$20 sps:$4 sm:$0xff]  }
 0x174   :  { %2466 = vmatprep.subr.bf16.mxu0 %v4409_v59  ;;  %2589 = vmatprep.subr.bf16.mxu1 %v4412_v60  ;;  %v4466_v58 = vld [vmem:[%s5873_s3 + $0x2b8] ss:$20 sps:$4 sm:$0xff]   ;;  %v4467_v59 = vld [vmem:[%s5873_s3 + $0x1a0] ss:$20 sps:$4 sm:$0xff]  }
 0x175   :  { %v4469_v60 = vld [vmem:[%s5873_s3 + $0x60] ss:$20 sps:$4 sm:$0xff]  }
 0x177   :  { %2467 = vmatpush1.bf16.msra.mxu0 %v4407_v62  ;;  %2590 = vmatpush1.bf16.msra.mxu1 %v4410_v63  ;;  %v4471_v62 = vld [vmem:[%s5873_s3 + $0x1c8] ss:$20 sps:$4 sm:$0xff]  }
 0x178   :  { %2468 = vmatprep.subr.bf16.mxu0 %v4415_v53  ;;  %2591 = vmatprep.subr.bf16.mxu1 %v4418_v1  ;;  %v4472_v63 = vld [vmem:[%s5873_s3 + $0x448] ss:$20 sps:$4 sm:$0xff]   ;;  %v4475_v1 = vld [vmem:[%s5873_s3 + $0x1f0] ss:$20 sps:$4 sm:$0xff]  }
 0x179   :  { %v4473_v53 = vld [vmem:[%s5873_s3 + $0x88] ss:$20 sps:$4 sm:$0xff]  }
 0x17b   :  { %2469 = vmatpush1.bf16.msra.mxu0 %v4413_v2  ;;  %2592 = vmatpush1.bf16.msra.mxu1 %v4416_v3  ;;  %v4476_v2 = vld [vmem:[%s5873_s3 + $0x470] ss:$20 sps:$4 sm:$0xff]  }
 0x17c   :  { %2470 = vmatprep.subr.bf16.mxu0 %v4421_v12  ;;  %2593 = vmatprep.subr.bf16.mxu1 %v4424_v5  ;;  %v4477_v3 = vld [vmem:[%s5873_s3 + $0xb0] ss:$20 sps:$4 sm:$0xff]   ;;  %v4479_v12 = vld [vmem:[%s5873_s3 + $0x218] ss:$20 sps:$4 sm:$0xff]  }
 0x17d   :  { %v4480_v5 = vld [vmem:[%s5873_s3 + $0x498] ss:$20 sps:$4 sm:$0xff]  }
 0x17f   :  { %2471 = vmatpush1.bf16.msra.mxu0 %v4419_v6  ;;  %2594 = vmatpush1.bf16.msra.mxu1 %v4422_v44  ;;  %v4481_v6 = vld [vmem:[%s5873_s3 + $0xd8] ss:$20 sps:$4 sm:$0xff]  }
 0x180   :  { %2481 = vmatprep.subr.bf16.mxu0 %v4427_v8  ;;  %2604 = vmatprep.subr.bf16.mxu1 %v4430_v9  ;;  %v4482_v44 = vld [vmem:[%s5873_s3 + $0x358] ss:$20 sps:$4 sm:$0xff]   ;;  %v4484_v8 = vld [vmem:[%s5873_s3 + $0x4c0] ss:$20 sps:$4 sm:$0xff]  }
 0x181   :  { %v4485_v9 = vld [vmem:[%s5873_s3 + $0x100] ss:$20 sps:$4 sm:$0xff]  }
 0x182   :  { %2473 = vmatmul.mubr.bf16.vlgmr.msra.gmra.mrb[8].mxu0 %v5469_v13  ;;  %2596 = vmatmul.mubr.bf16.vlgmr.msra.gmra.mrb[8].mxu1 %v5469_v13 }
 0x183   :  { %2482 = vmatpush1.bf16.msra.mxu0 %v4425_v10  ;;  %2605 = vmatpush1.bf16.msra.mxu1 %v4428_v11  ;;  %v4486_v10 = vld [vmem:[%s5873_s3 + $0x380] ss:$20 sps:$4 sm:$0xff]   ;;  %v4487_v11 = vld [vmem:[%s5873_s3 + $0x268] ss:$20 sps:$4 sm:$0xff]  }
 0x184   :  { %2483 = vmatprep.subr.bf16.mxu0 %v4433_v14  ;;  %2606 = vmatprep.subr.bf16.mxu1 %v4436_v15  ;;  %v4488_v14 = vld [vmem:[%s5873_s3 + $0x4e8] ss:$20 sps:$4 sm:$0xff]  }
 0x185   :  { %2513 = vmatprep.mubr.bf16.mxu0 %v4547_v61  ;;  %2636 = vmatprep.mubr.bf16.mxu1 %v4547_v61  ;;  %v4448_v61 = vld [vmem:[%s5873_s3 + $0x584] ss:$20 sps:$4 sm:$0xff]   ;;  %v4489_v15 = vld [vmem:[%s5873_s3 + $0x128] ss:$20 sps:$4 sm:$0xff]  }
 0x187   :  { %2484 = vmatpush1.bf16.msra.mxu0 %v4431_v17  ;;  %2607 = vmatpush1.bf16.msra.mxu1 %v4434_v18  ;;  %v4490_v17 = vld [vmem:[%s5873_s3 + $0x3a8] ss:$20 sps:$4 sm:$0xff]   ;;  %v4497_v18 = vld [vmem:[%s5875_s5 + $0x40] sm:$0xff]  }
 0x188   :  { %2485 = vmatprep.subr.bf16.mxu0 %v4439_v19  ;;  %2608 = vmatprep.subr.bf16.mxu1 %v4442_v20  ;;  %v4491_v19 = vld [vmem:[%s5873_s3 + $0x510] ss:$20 sps:$4 sm:$0xff]   ;;  %v4548_v20 = vmov 0.0  }
 0x18b   :  { %2486 = vmatpush1.bf16.msra.mxu0 %v4437_v21  ;;  %2609 = vmatpush1.bf16.msra.mxu1 %v4440_v24  ;;  %v4499_v21 = vld [vmem:[%s5875_s5] sm:$0xff]   ;;  %v4501_v24 = vld [vmem:[%s5875_s5 + $0x48] sm:$0xff]  }
 0x18c   :  { %2487 = vmatprep.subr.bf16.mxu0 %v4445_v25  ;;  %2610 = vmatprep.subr.bf16.mxu1 %v4448_v61  ;;  %v4492_v25 = vld [vmem:[%s5873_s3 + $0x538] ss:$20 sps:$4 sm:$0xff]   ;;  %v4493_v61 = vld [vmem:[%s5873_s3 + $0x560] ss:$20 sps:$4 sm:$0xff]  }
 0x18f   :  { %2488 = vmatpush1.bf16.msra.mxu0 %v4443_v26  ;;  %2611 = vmatpush1.bf16.msra.mxu1 %v4446_v27  ;;  %v4507_v26 = vld [vmem:[%s5875_s5 + $0x10] sm:$0xff]   ;;  %v4509_v27 = vld [vmem:[%s5875_s5 + $0x58] sm:$0xff]  }
 0x190   :  { %2489 = vmatprep.subr.bf16.mxu0 %v4451_v28  ;;  %2612 = vmatprep.subr.bf16.mxu1 %v4454_v31  ;;  %v4494_v28 = vld [vmem:[%s5873_s3 + $0x588] ss:$20 sps:$4 sm:$0xff]  }
 0x191   :  { %v4511_v31 = vld [vmem:[%s5875_s5 + $0x18] sm:$0xff]  }
 0x193   :  { %2490 = vmatpush1.bf16.msra.mxu0 %v4449_v34  ;;  %2613 = vmatpush1.bf16.msra.mxu1 %v4452_v36  ;;  %v4496_v34 = vld [vmem:[%s5873_s3 + $0x5d8] ss:$0 sps:$4 sm:$0xff]   ;;  %v4515_v36 = vld [vmem:[%s5875_s5 + $0x20] sm:$0xff]  }
 0x194   :  { %3789 = vmatprep.subr.msk.bf16.mxu0 %vm2383_vm1, %v3785_v37  ;;  %3791 = vmatprep.subr.msk.bf16.mxu1 %vm2383_vm1, %v3787_v39  ;;  %v4517_v37 = vld [vmem:[%s5875_s5 + $0x68] sm:$0xff]   ;;  %v2397_v39 = vsel %vm2383_vm1, %v4496_v34, 0 }
 0x197   :  { %2492 = vmatpush1.bf16.msra.mxu0 %v2385_v46  ;;  %2615 = vmatpush1.bf16.msra.mxu1 %v2391_v47  ;;  %v4502_v46 = vld [vmem:[%s5875_s5 + $0xc8] sm:$0xff]  }
 0x198   :  { %3862 = vmatprep.subr.bf16.mxu0 %v4459_v49  ;;  %3884 = vmatprep.subr.bf16.mxu1 %v4460_v50  ;;  %v4504_v47 = vld [vmem:[%s5875_s5 + $0x88] sm:$0xff]   ;;  %v4506_v49 = vld [vmem:[%s5875_s5 + $0xd0] sm:$0xff]  }
 0x199   :  { %v4508_v50 = vld [vmem:[%s5875_s5 + $0x90] sm:$0xff]  }
 0x19a   :  { %3790 = vmatmul.mubr.msk.bf16.vlgmr.msra.gmra.mrb[8].mxu0 %vm2379_vm2, %v5540_v51  ;;  %3792 = vmatmul.mubr.msk.bf16.vlgmr.msra.gmra.mrb[8].mxu1 %vm2379_vm2, %v5540_v51 }
 0x19b   :  { %3863 = vmatpush3.bf16.msra.mxu0 %v4461_v43  ;;  %2677 = vmatprep.mubr.bf16.mxu0 %v5246_v38  ;;  %v4468_v38 = vld [vmem:[%s5873_s3 + $0x420] ss:$20 sps:$4 sm:$0xff]   ;;  %v4512_v43 = vld [vmem:[%s5875_s5 + $0x98] sm:$0xff]  }
 0x19c   :  { %3885 = vmatpush3.bf16.msra.mxu1 %v4462_v52  ;;  %2717 = vmatprep.mubr.bf16.mxu1 %v5280_v55  ;;  %v4470_v55 = vld [vmem:[%s5873_s3 + $0x2e0] ss:$20 sps:$4 sm:$0xff]  }
 0x19d   :  { %3864 = vmatprep.subr.bf16.mxu0 %v4463_v54  ;;  %3886 = vmatprep.subr.bf16.mxu1 %v4464_v56  ;;  %v4514_v52 = vld [vmem:[%s5875_s5 + $0xe0] sm:$0xff]   ;;  %v4518_v56 = vld [vmem:[%s5875_s5 + $0xe8] sm:$0xff]  }
 0x19e   :  { %v4516_v54 = vld [vmem:[%s5875_s5 + $0xa0] sm:$0xff]  }
 0x19f   :  { %3865 = vmatpush3.bf16.msra.mxu0 %v4465_v57  ;;  %v4520_v57 = vld [vmem:[%s5875_s5 + $0xa8] sm:$0xff]  }
 0x1a0   :  { %3887 = vmatpush3.bf16.msra.mxu1 %v4466_v58  ;;  %3866 = vmatprep.subr.bf16.mxu0 %v4467_v59  ;;  %v4521_v58 = vld [vmem:[%s5875_s5 + $0x70] sm:$0xff]  }
 0x1a1   :  { %3888 = vmatprep.subr.bf16.mxu1 %v4468_v38  ;;  %v4522_v59 = vld [vmem:[%s5875_s5 + $0xf0] sm:$0xff]  }
 0x1a2   :  { %v4523_v38 = vld [vmem:[%s5875_s5 + $0x30] sm:$0xff]  }
 0x1a3   :  { %3867 = vmatpush3.bf16.msra.mxu0 %v4469_v60  ;;  %v4524_v60 = vld [vmem:[%s5875_s5 + $0xb0] sm:$0xff]  }
 0x1a4   :  { %3889 = vmatpush3.bf16.msra.mxu1 %v4470_v55  ;;  %3868 = vmatprep.subr.bf16.mxu0 %v4471_v62  ;;  %v4525_v55 = vld [vmem:[%s5875_s5 + $0x78] sm:$0xff]  }
 0x1a5   :  { %3890 = vmatprep.subr.bf16.mxu1 %v4472_v63  ;;  %v4526_v62 = vld [vmem:[%s5875_s5 + $0xf8] sm:$0xff]  }
 0x1a6   :  { %v4527_v63 = vld [vmem:[%s5875_s5 + $0x38] sm:$0xff]  }
 0x1a7   :  { %3869 = vmatpush3.bf16.msra.mxu0 %v4473_v53  ;;  %v4528_v53 = vld [vmem:[%s5875_s5 + $0xb8] sm:$0xff]  }
 0x1a8   :  { %3891 = vmatpush3.bf16.msra.mxu1 %v4474_v0  ;;  %3870 = vmatprep.subr.bf16.mxu0 %v4475_v1  ;;  %v1377_v0 = vld [vmem:[%s5876_s4] sm:$0x1f] }
 0x1a9   :  { %3892 = vmatprep.subr.bf16.mxu1 %v4476_v2  ;;  %v1382_v1 = vrot.slane %v1377_v0, %v221_v22  ;;  %v1390_v2 = vrot.slane %v1377_v0, %v229_v48 }
 0x1ab   :  { %3871 = vmatpush3.bf16.msra.mxu0 %v4477_v3  ;;  %v1386_v3 = vrot.slane %v1377_v0, %v225_v23 }
 0x1ac   :  { %3893 = vmatpush3.bf16.msra.mxu1 %v4478_v4  ;;  %3872 = vmatprep.subr.bf16.mxu0 %v4479_v12  ;;  %v1394_v4 = vrot.slane %v1377_v0, %v233_v29  ;;  %v4529_v29 = vld [vmem:[%s5875_s5 + $0x100] sm:$0xff]  }
 0x1ad   :  { %3894 = vmatprep.subr.bf16.mxu1 %v4480_v5 }
 0x1af   :  { %3873 = vmatpush3.bf16.msra.mxu0 %v4481_v6 }
 0x1b0   :  { %3895 = vmatpush3.bf16.msra.mxu1 %v4482_v44  ;;  %3874 = vmatprep.subr.bf16.mxu0 %v4483_v7 }
 0x1b1   :  { %3896 = vmatprep.subr.bf16.mxu1 %v4484_v8 }
 0x1b3   :  { %3875 = vmatpush3.bf16.msra.mxu0 %v4485_v9 }
 0x1b4   :  { %3897 = vmatpush3.bf16.msra.mxu1 %v4486_v10  ;;  %3876 = vmatprep.subr.bf16.mxu0 %v4487_v11 }
 0x1b5   :  { %3898 = vmatprep.subr.bf16.mxu1 %v4488_v14 }
 0x1b7   :  { %3877 = vmatpush3.bf16.msra.mxu0 %v4489_v15 }
 0x1b8   :  { %3899 = vmatpush3.bf16.msra.mxu1 %v4490_v17  ;;  %3970 = vmatprep.subr.bf16.mxu0 %v4548_v20 }
 0x1b9   :  { %3913 = vmatprep.subr.bf16.mxu1 %v4497_v18 }
 0x1ba   :  { %2678 = vmatmul.mubr.bf16.vlgmr.msra.gmra.mrb[12].mxu0 %v5254_v41  ;;  %v4503_v41 = vld [vmem:[%s5875_s5 + $0x8] sm:$0xff]  }
 0x1bb   :  { %2718 = vmatmul.mubr.bf16.vlgmr.msra.gmra.mrb[12].mxu1 %v5469_v13  ;;  %3971 = vmatpush3.bf16.msra.mxu0 %v4491_v19  ;;  %v4505_v13 = vld [vmem:[%s5875_s5 + $0x50] sm:$0xff]  }
 0x1bc   :  { %3972 = vmatprep.subr.bf16.mxu0 %v4548_v20  ;;  %3982 = vmatprep.mubr.msk.bf16.mxu0 %vm4549_vm3, %v4548_v20 }
 0x1bd   :  { %3914 = vmatpush3.bf16.msra.mxu1 %v4499_v21 }
 0x1be   :  { %3915 = vmatprep.subr.bf16.mxu1 %v4501_v24 }
 0x1bf   :  { %3973 = vmatpush3.bf16.msra.mxu0 %v4492_v25 }
 0x1c0   :  { %3974 = vmatprep.subr.bf16.mxu0 %v4548_v20 }
 0x1c1   :  { %3916 = vmatpush3.bf16.msra.mxu1 %v4503_v41  ;;  %v4530_v41 = vld [vmem:[%s5875_s5 + $0x108] sm:$0xff]  }
 0x1c2   :  { %3917 = vmatprep.subr.bf16.mxu1 %v4505_v13  ;;  %v4531_v13 = vld [vmem:[%s5875_s5 + $0x110] sm:$0xff]  }
 0x1c3   :  { %3975 = vmatpush3.bf16.msra.mxu0 %v4493_v61  ;;  %v4532_v61 = vld [vmem:[%s5875_s5 + $0x118] sm:$0xff]  }
 0x1c4   :  { %3976 = vmatprep.subr.bf16.mxu0 %v4548_v20 }
 0x1c5   :  { %3918 = vmatpush3.bf16.msra.mxu1 %v4507_v26  ;;  %v4533_v26 = vld [vmem:[%s5875_s5 + $0x120] sm:$0xff]  }
 0x1c6   :  { %3919 = vmatprep.subr.bf16.mxu1 %v4509_v27  ;;  %v4534_v27 = vld [vmem:[%s5875_s5 + $0x128] ss:$0 sps:$4 sm:$0xff]  }
 0x1c7   :  { %3977 = vmatpush3.bf16.msra.mxu0 %v4494_v28  ;;  %v3079_v28 = vsel %vm2383_vm1, %v4534_v27, 0 }
 0x1c8   :  { %3978 = vmatprep.subr.bf16.mxu0 %v4548_v20 }
 0x1c9   :  { %3920 = vmatpush3.bf16.msra.mxu1 %v4511_v31 }
 0x1ca   :  { %3921 = vmatprep.subr.bf16.mxu1 %v4513_v32  ;;  %v1398_v32 = vrot.slane %v1377_v0, %v237_v16  ;;  %v4550_v16 = vmov 65535  }
 0x1cb   :  { %3979 = vmatpush3.bf16.msra.mxu0 %v4495_v33 }
 0x1cc   :  { %3980 = vmatprep.subr.bf16.mxu0 %v4548_v20 }
 0x1cd   :  { %3922 = vmatpush3.bf16.msra.mxu1 %v4515_v36 }
 0x1ce   :  { %3923 = vmatprep.subr.bf16.mxu1 %v4517_v37 }
 0x1cf   :  { %3981 = vmatpush3.bf16.msra.mxu0 %v2397_v39 }
 0x1d0   :  { %3935 = vmatprep.subr.bf16.mxu0 %v4498_v40 }
 0x1d1   :  { %3924 = vmatpush3.bf16.msra.mxu1 %v4519_v42 }
 0x1d2   :  { %3983 = vmatmul.mubr.msk.bf16.vlgmr.msra.gmra.mrb[16].mxu0 %vm2379_vm2, %v5540_v51  ;;  %v4510_v51 = vld [vmem:[%s5875_s5 + $0xd8] sm:$0xff]   ;;  %3925 = vmatprep.subr.bf16.mxu1 %v4521_v58  ;;  %v3215_v58 = vsel %vm3213_vm4, 4294967295, %v4550_v16 }
 0x1d3   :  { %3936 = vmatpush3.bf16.msra.mxu0 %v4500_v45 }
 0x1d4   :  { %3937 = vmatprep.subr.bf16.mxu0 %v4502_v46 }
 0x1d5   :  { %3926 = vmatpush3.bf16.msra.mxu1 %v4523_v38 }
 0x1d6   :  { %3927 = vmatprep.subr.bf16.mxu1 %v4525_v55 }
 0x1d7   :  { %3938 = vmatpush3.bf16.msra.mxu0 %v4504_v47 }
 0x1d8   :  { %3939 = vmatprep.subr.bf16.mxu0 %v4506_v49 }
 0x1d9   :  { %3928 = vmatpush3.bf16.msra.mxu1 %v4527_v63 }
 0x1da   :  { %3986 = vmatprep.subr.bf16.mxu1 %v4548_v20 }
 0x1db   :  { %3940 = vmatpush3.bf16.msra.mxu0 %v4508_v50 }
 0x1dc   :  { %3941 = vmatprep.subr.bf16.mxu0 %v4510_v51 }
 0x1df   :  { %3942 = vmatpush3.bf16.msra.mxu0 %v4512_v43 }
 0x1e0   :  { %3943 = vmatprep.subr.bf16.mxu0 %v4514_v52 }
 0x1e3   :  { %3944 = vmatpush3.bf16.msra.mxu0 %v4516_v54 }
 0x1e4   :  { %3945 = vmatprep.subr.bf16.mxu0 %v4518_v56 }
 0x1e7   :  { %3946 = vmatpush3.bf16.msra.mxu0 %v4520_v57 }
 0x1e8   :  { %3947 = vmatprep.subr.bf16.mxu0 %v4522_v59  ;;  %v5815_v59 = vsel %vm3214_vm5, %v3215_v58, 0 }
 0x1e9   :  { %v3218_v38 = vand.u32 %v4535_v35, %v5815_v59 }
 0x1eb   :  { %3948 = vmatpush3.bf16.msra.mxu0 %v4524_v60 }
 0x1ec   :  { %3949 = vmatprep.subr.bf16.mxu0 %v4526_v62 }
 0x1ef   :  { %3950 = vmatpush3.bf16.msra.mxu0 %v4528_v53 }
 0x1f0   :  { %4002 = vmatprep.subr.bf16.mxu0 %v4548_v20 }
 0x26d   :  { %v2515_v12 = vpop.f32.mrb[8].mxu0  ;;  %v2638_v5 = vpop.f32.mrb[8].mxu1 }
 0x26e   :  { %v4024_v6 = vadd.f32 %v2515_v12, %v1382_v1  ;;  %v4026_v44 = vadd.f32 %v2638_v5, %v1390_v2  ;;  %v2517_v7 = vpop.f32.mrb[9].mxu0  ;;  %v2640_v8 = vpop.f32.mrb[9].mxu1 }
 0x26f   :  { %v4025_v9 = vadd.f32 %v2517_v7, %v1386_v3  ;;  %v4027_v10 = vadd.f32 %v2640_v8, %v1394_v4  ;;  %v2519_v11 = vpop.f32.mrb[10].mxu0  ;;  %v2642_v14 = vpop.f32.mrb[10].mxu1 }
 0x270   :  { %v2765_v22 = vmax.f32 %v4024_v6, 0.0  ;;  %v2767_v15 = vmax.f32 %v4026_v44, 0.0  ;;  %v2520_v17 = vpop.f32.mrb[11].mxu0  ;;  %v2643_v48 = vpop.f32.mrb[11].mxu1 }
 0x271   :  { %v2766_v18 = vmax.f32 %v4025_v9, 0.0  ;;  %v2768_v19 = vmax.f32 %v4027_v10, 0.0  ;;  %v3261_v10 = vand.u32 127, %v46_v30 }
 0x272   :  { %v2770_v24 = vpack.c.bf16 %v2765_v22, %v2765_v22  ;;  %v2772_v25 = vpack.c.bf16 %v2767_v15, %v2767_v15 }
 0x273   :  { %v2771_v23 = vpack.c.bf16 %v2766_v18, %v2766_v18  ;;  %v2773_v21 = vpack.c.bf16 %v2768_v19, %v2768_v19  ;;  %vm3279_vm7 = vcmp.ge.s32.totalorder %v3261_v10, 10  ;;  %vm3280_vm8 = vcmp.lt.s32.totalorder %v3261_v10, 15 }
 0x274   :  { %vm3271_vm9 = vcmp.ge.s32.totalorder %v3261_v10, 5  ;;  %vm3272_vm10 = vcmp.lt.s32.totalorder %v3261_v10, 10  ;;  %vm5827_vm11 = vmand %vm3279_vm7, %vm3280_vm8  ;;  %vm3263_vm12 = vcmp.lt.s32.totalorder %v3261_v10, 5 }
 0x275   :  { %3113 = vmatprep.mubr.bf16.mxu1 %v2771_v23  ;;  %3153 = vmatprep.mubr.bf16.mxu0 %v2773_v21  ;;  %vm5831_vm14 = vmand %vm3271_vm9, %vm3272_vm10 }
 0x276   :  { %3114 = vmatmul.mubr.bf16.vlgmr.msra.gmra.mrb[16].mxu1 %v2770_v24  ;;  %3154 = vmatmul.mubr.bf16.vlgmr.msra.gmra.mrb[20].mxu0 %v2772_v25 }
 0x277   :  { %3987 = vmatpush3.bf16.msra.mxu1 %v4529_v29  ;;  %3998 = vmatprep.mubr.msk.bf16.mxu1 %vm4549_vm3, %v4548_v20  ;;  %v4536_v29 = vld [vmem:[%s5878_s7] sm:$0xff]  }
 0x278   :  { %3988 = vmatprep.subr.bf16.mxu1 %v4548_v20  ;;  %4004 = vmatprep.mubr.msk.bf16.mxu0 %vm4549_vm3, %v4548_v20  ;;  %v3302_v24 = vand.u32 %v4536_v29, %v5815_v59 }
 0x279   :  { %4003 = vmatpush3.bf16.msra.mxu0 %v3218_v38 }
 0x27a   :  { %4014 = vmatprep.subr.bf16.mxu0 %v4548_v20 }
 0x27b   :  { %3989 = vmatpush3.bf16.msra.mxu1 %v4530_v41 }
 0x27c   :  { %3990 = vmatprep.subr.bf16.mxu1 %v4548_v20 }
 0x27f   :  { %3991 = vmatpush3.bf16.msra.mxu1 %v4531_v13 }
 0x280   :  { %3992 = vmatprep.subr.bf16.mxu1 %v4548_v20 }
 0x283   :  { %3993 = vmatpush3.bf16.msra.mxu1 %v4532_v61 }
 0x284   :  { %3994 = vmatprep.subr.bf16.mxu1 %v4548_v20 }
 0x287   :  { %3995 = vmatpush3.bf16.msra.mxu1 %v4533_v26 }
 0x288   :  { %3996 = vmatprep.subr.bf16.mxu1 %v4548_v20 }
 0x28b   :  { %3997 = vmatpush3.bf16.msra.mxu1 %v3079_v28 }
 0x28c   :  { %4008 = vmatprep.subr.bf16.mxu1 %v4548_v20 }
 0x28d   :  { %v3878_v31 = vpop.f32.mrb[12].mxu0 }
 0x28e   :  { %v3900_v33 = vpop.f32.mrb[12].mxu1  ;;  %v3879_v34 = vpop.f32.mrb[13].mxu0 }
 0x28f   :  { %v3880_v36 = vadd.f32 %v3879_v34, %v3878_v31  ;;  %v3901_v37 = vpop.f32.mrb[13].mxu1  ;;  %v3881_v39 = vpop.f32.mrb[14].mxu0  ;;  %v4537_v34 = vld [vmem:[%s5879_s8] sm:$0xff]  }
 0x290   :  { %v3902_v40 = vadd.f32 %v3901_v37, %v3900_v33  ;;  %v3903_v42 = vpop.f32.mrb[14].mxu1  ;;  %v3882_v45 = vpop.f32.mrb[15].mxu0 }
 0x291   :  { %v2680_v46 = vadd.f32 %v3880_v36, %v1398_v32  ;;  %v3904_v47 = vpop.f32.mrb[15].mxu1  ;;  %v3372_v36 = vand.u32 %v4537_v34, %v5815_v59 }
 0x293   :  { %v2720_v49 = vadd.f32 %v3902_v40, %v2680_v46  ;;  %v3348_v46 = vstv %s3347_s14 }
 0x2a5   :  { %v2759_v50 = vpop.f32.mrb[16].mxu0 }
 0x2a6   :  { %v2760_v51 = vadd.f32 %v2759_v50, %v2720_v49  ;;  %v3984_v43 = vpop.f32.mrb[17].mxu0  ;;  %v3350_v49 = vstv %s5880_s10 }
 0x2a7   :  { %v2762_v52 = vpop.f32.mrb[18].mxu0 }
 0x2a8   :  { %v2769_v54 = vmax.f32 %v2760_v51, 0.0  ;;  %v3985_v56 = vpop.f32.mrb[19].mxu0 }
 0x2aa   :  { %v2774_v57 = vpack.c.bf16 %v2769_v54, %v2769_v54  ;;  %v3837_v54 = vld [vmem:[%s5881_s9] ss:$0 sm:$0xff] }
 0x2ac   :  { %3999 = vmatmul.mubr.msk.bf16.vlgmr.msra.gmra.mrb[20].mxu1 %vm2379_vm2, %v2774_v57 }
 0x2ad   :  { %4010 = vmatprep.mubr.msk.bf16.mxu1 %vm4549_vm3, %v4548_v20  ;;  %4009 = vmatpush3.bf16.msra.mxu1 %v3302_v24 }
 0x349   :  { %v3929_v60 = vpop.f32.mrb[16].mxu1  ;;  %v3951_v55 = vpop.f32.mrb[20].mxu0 }
 0x34a   :  { %v3930_v62 = vpop.f32.mrb[17].mxu1  ;;  %v3952_v63 = vpop.f32.mrb[21].mxu0 }
 0x34b   :  { %v3931_v53 = vadd.f32 %v3930_v62, %v3929_v60  ;;  %v3953_v0 = vadd.f32 %v3952_v63, %v3951_v55  ;;  %v3932_v1 = vpop.f32.mrb[18].mxu1  ;;  %v3954_v2 = vpop.f32.mrb[22].mxu0 }
 0x34c   :  { %v3933_v3 = vpop.f32.mrb[19].mxu1  ;;  %v3955_v4 = vpop.f32.mrb[23].mxu0 }
 0x34d   :  { %v3156_v12 = vadd.f32 %v3953_v0, %v3931_v53 }
 0x37f   :  { %v3195_v5 = vpop.f32.mrb[20].mxu1 }
 0x380   :  { %v5819_v6 = vadd.f32 %v3195_v5, %v3156_v12  ;;  %v4000_v44 = vpop.f32.mrb[21].mxu1 }
 0x381   :  { %v3198_v7 = vpop.f32.mrb[22].mxu1 }
 0x382   :  { %v3201_v8 = vpack.c.bf16 %v5819_v6, %v5819_v6  ;;  %v4001_v9 = vpop.f32.mrb[23].mxu1 }
 0x384   :  { %4005 = vmatmul.mubr.msk.bf16.vlgmr.msra.gmra.mrb[24].mxu0 %vm3209_vm6, %v3201_v8 }
 0x385   :  { %4016 = vmatprep.mubr.msk.bf16.mxu0 %vm4549_vm3, %v4548_v20  ;;  %4015 = vmatpush3.bf16.msra.mxu0 %v3372_v36 }
 0x457   :  { %v3254_v14 = vpop.f32.mrb[24].mxu0 }
 0x458   :  { %v4006_v15 = vpop.f32.mrb[25].mxu0  ;;  %v3282_v20 = vsel %vm5827_vm11, %v3254_v14, -inf  ;;  %v3265_v30 = vsel %vm3263_vm12, %v3254_v14, -inf  ;;  %v3274_v23 = vsel %vm5831_vm14, %v3254_v14, -inf }
 0x459   :  { %v3257_v17 = vpop.f32.mrb[26].mxu0  ;;  %v3283_v48 = vsel %vm3266_vm13, %v3282_v20, -inf  ;;  %v3267_v18 = vsel %vm3266_vm13, %v3265_v30, -inf  ;;  %v3275_v21 = vsel %vm3266_vm13, %v3274_v23, -inf }
 0x45a   :  { %3284 = vmax.xlane.f32.xlu1 %v3283_v48  ;;  %3268 = vmax.xlane.f32.xlu0 %v3267_v18  ;;  %v4007_v19 = vpop.f32.mrb[27].mxu0 }
 0x45e   :  { %3276 = vmax.xlane.f32.xlu0 %v3275_v21 }
 0x4e7   :  { %v3269_v25 = vpop.xlane.xlu0 %3268  ;;  %v3285_v61 = vpop.xlane.xlu1 %3284 }
 0x4e8   :  { %v3270_v41 = vsel %vm3263_vm12, %v3269_v25, 0.0 }
 0x4eb   :  { %v3277_v13 = vpop.xlane.xlu0 %3276 }
 0x4ec   :  { %v3278_v26 = vsel %vm5831_vm14, %v3277_v13, %v3270_v41 }
 0x4ed   :  { %v3286_v27 = vsel %vm5827_vm11, %v3285_v61, %v3278_v26 }
 0x4ee   :  { %v3287_v28 = vsub.f32 %v3254_v14, %v3286_v27 }
 0x4f0   :  { %v3288_v31 = vmul.f32 1.442695, %v3287_v28 }
 0x4f2   :  { %4538 = vpow2.f32 %v3288_v31 }
 0x4fc   :  { %v4539_v32 = vpop.eup %4538 }
 0x4fd   :  { %v3290_v33 = vpack.c.bf16 %v4539_v32, %v4539_v32 }
 0x4ff   :  { %4011 = vmatmul.mubr.msk.bf16.vlgmr.msra.gmra.mrb[24].mxu1 %vm3209_vm6, %v3290_v33 }
 0x5d2   :  { %v3338_v37 = vpop.f32.mrb[24].mxu1 }
 0x5d3   :  { %4540 = vrcp.f32 %v3338_v37  ;;  %v4012_v39 = vpop.f32.mrb[25].mxu1 }
 0x5d4   :  { %v3341_v40 = vpop.f32.mrb[26].mxu1 }
 0x5d5   :  { %v4013_v42 = vpop.f32.mrb[27].mxu1 }
 0x5dd   :  { %v4541_v45 = vpop.eup %4540 }
 0x5de   :  { %v3345_v47 = vmul.f32 %v4541_v45, %v4539_v32 }
 0x5e0   :  { %v3349_v50 = vmul.f32 %v3348_v46, %v3345_v47 }
 0x5e2   :  { %v3351_v51 = vadd.f32 %v3350_v49, %v3349_v50 }
 0x5e4   :  { %v3352_v43 = vmul.f32 %v3351_v51, %v5819_v6 }
 0x5e6   :  { %v3353_v52 = vpack.c.bf16 %v3352_v43, %v3352_v43 }
 0x5e8   :  { %4017 = vmatmul.mubr.msk.bf16.vlgmr.msra.gmra.mrb[28].mxu0 %vm3209_vm6, %v3353_v52 }
 0x6bb   :  { %v3408_v56 = vpop.f32.mrb[28].mxu0 }
 0x6bc   :  { %v3409_v57 = vadd.f32 %v3837_v54, %v3408_v56  ;;  %v4018_v35 = vpop.f32.mrb[29].mxu0 }
 0x6bd   :  { %v3411_v16 = vpop.f32.mrb[30].mxu0 }
 0x6be   :  { %3414 = vxpose.xlu1.b32.start.end [1/1] (short) (narrow) %v3409_v57, 8  ;;  %v4019_v58 = vpop.f32.mrb[31].mxu0 }
 0x73e   :  { %v3430_v59 = vpop.trf.xlu1 }
 0x73f   :  { %v3447_v38 = vsel %vm3446_vm15, %v3430_v59, -inf }
 0x740   :  { %v3448_v60 = vrot.slane %v3447_v38, 4 }
 0x742   :  { %v3449_v55 = vmax.f32 %v3447_v38, %v3448_v60 }
 0x744   :  { %v3450_v62 = vrot.slane %v3449_v55, 2 }
 0x746   :  { %v3451_v63 = vmax.f32 %v3449_v55, %v3450_v62 }
 0x748   :  { %v3452_v53 = vrot.slane %v3451_v63, 1 }
 0x74a   :  { %v3453_v0 = vmax.f32 %v3451_v63, %v3452_v53 }
 0x74c   :  { %v3454_v1 = vsub.f32 %v3430_v59, %v3453_v0 }
 0x74e   :  { %v3455_v2 = vmul.f32 1.442695, %v3454_v1 }
 0x750   :  { %4542 = vpow2.f32 %v3455_v2 }
 0x75a   :  { %v4543_v3 = vpop.eup %4542 }
 0x75b   :  { %v3457_v4 = vsel %vm3446_vm15, %v4543_v3, 0.0 }
 0x75c   :  { %v3458_v12 = vrot.slane %v3457_v4, 4 }
 0x75e   :  { %v3459_v5 = vadd.f32 %v3458_v12, %v3457_v4 }
 0x760   :  { %v3460_v6 = vrot.slane %v3459_v5, 2 }
 0x762   :  { %v3461_v44 = vadd.f32 %v3460_v6, %v3459_v5 }
 0x764   :  { %v3462_v7 = vrot.slane %v3461_v44, 1 }
 0x766   :  { %v3463_v8 = vadd.f32 %v3462_v7, %v3461_v44 }
 0x768   :  { %4544 = vrcp.f32 %v3463_v8 }
 0x772   :  { %v4545_v9 = vpop.eup %4544 }
 0x773   :  { %v3465_v10 = vmul.f32 %v4545_v9, %v4543_v3 }
 0x775   :  { %3466 = vst.msk [vmem:[%s5882_s11] sm:$0x7] %vm3446_vm15, %v3465_v10 }

</bundles_post_ra>
